<compile_context>
chip_gen: v6e
topology: v6e:2x2x1
jax: 0.10.0
libtpu: 0.0.40
codegen_flags: <defaults>
</compile_context>

<pallas_src>
import math

import jax
import jax.numpy as jnp
import numpy as np
from jax.experimental import pallas as pl
from jax.experimental.pallas import tpu as pltpu


# ----------------------------- kernel helpers ------------------------------

def _layer_norm(x, g, b, eps=1e-5):
    mu = jnp.mean(x, axis=-1, keepdims=True)
    var = jnp.mean((x - mu) ** 2, axis=-1, keepdims=True)
    return (x - mu) * jax.lax.rsqrt(var + eps) * g + b


def _gelu_exact(x):
    # activation='gelu' in nn.TransformerEncoderLayer -> F.gelu (erf form)
    return 0.5 * x * (1.0 + jax.lax.erf(x * 0.7071067811865476))


def _pick_batch_tile(batch, seq, target_rows=256):
    """Largest divisor of `batch` s.t. the flattened row-slab <= target_rows."""
    best = 1
    for bt in range(1, batch + 1):
        if batch % bt != 0:
            continue
        rows = bt * seq
        if bt != batch and rows % 8 != 0:      # keep sublane-aligned tiles
            continue
        if rows <= max(target_rows, seq):
            best = bt
    return best


def _full_spec(arr):
    """Whole-array block with a constant index map (resident across the grid)."""
    nd = arr.ndim
    return pl.BlockSpec(arr.shape, lambda i, _nd=nd: (0,) * _nd)


# ------------------------------ fused kernel -------------------------------

def make_transformer_kernel(num_layers, num_heads, d_model, d_ff,
                            batch_tile, seq_len, batch_size, num_out):
    head_dim = d_model // num_heads
    scale = 1.0 / math.sqrt(head_dim)
    rows = batch_tile * seq_len

    def kernel(x_ref,
               wq_ref, bq_ref, wk_ref, bk_ref, wv_ref, bv_ref,
               wo_ref, bo_ref, ln1g_ref, ln1b_ref,
               w1_ref, b1_ref, w2_ref, b2_ref, ln2g_ref, ln2b_ref,
               wfc_ref, bfc_ref,
               out_ref, acc_ref):
        bt_idx = pl.program_id(0)

        @pl.when(bt_idx == 0)
        def _init():
            acc_ref[...] = jnp.zeros_like(acc_ref)

        h = x_ref[...].astype(jnp.float32)                 # (Bt*S, D) slab

        for l in range(num_layers):                        # layers fused in-kernel
            # ---- self-attention block (post-norm, norm_first=False) ----
            # Q/K/V as three separate matmuls on the row slab: no lane slicing
            # of a fused qkv output at non-128 boundaries.
            q = jnp.dot(h, wq_ref[l], preferred_element_type=jnp.float32) + bq_ref[l]
            k = jnp.dot(h, wk_ref[l], preferred_element_type=jnp.float32) + bk_ref[l]
            v = jnp.dot(h, wv_ref[l], preferred_element_type=jnp.float32) + bv_ref[l]

            if num_heads == 1:
                # head-batched attention over the batch axis (3-D einsums).
                q3 = q.reshape(batch_tile, seq_len, head_dim) * scale
                k3 = k.reshape(batch_tile, seq_len, head_dim)
                v3 = v.reshape(batch_tile, seq_len, head_dim)
                s = jnp.einsum("bqd,bkd->bqk", q3, k3,
                               preferred_element_type=jnp.float32)
                s = s - jnp.max(s, axis=-1, keepdims=True)
                p = jnp.exp(s)
                p = p * pl.reciprocal(jnp.sum(p, axis=-1, keepdims=True),
                                      approx=True)
                a = jnp.einsum("bqk,bkd->bqd", p, v3,
                               preferred_element_type=jnp.float32)
                attn = a.reshape(rows, d_model)
            else:
                # TODO(synk): the module's fc (in_features=embedding_dim) is only
                # dimension-consistent with the transformer output for
                # num_heads==1; this head-batched path is provided for
                # completeness but is not exercised by the example.
                q4 = q.reshape(batch_tile, seq_len, num_heads, head_dim) * scale
                k4 = k.reshape(batch_tile, seq_len, num_heads, head_dim)
                v4 = v.reshape(batch_tile, seq_len, num_heads, head_dim)
                s = jnp.einsum("bqhd,bkhd->bhqk", q4, k4,
                               preferred_element_type=jnp.float32)
                s = s - jnp.max(s, axis=-1, keepdims=True)
                p = jnp.exp(s)
                p = p * pl.reciprocal(jnp.sum(p, axis=-1, keepdims=True),
                                      approx=True)
                a = jnp.einsum("bhqk,bkhd->bqhd", p, v4,
                               preferred_element_type=jnp.float32)
                attn = a.reshape(rows, d_model)

            attn = jnp.dot(attn, wo_ref[l],
                           preferred_element_type=jnp.float32) + bo_ref[l]
            y = _layer_norm(h + attn, ln1g_ref[l], ln1b_ref[l])

            # ---- feed-forward block ----
            f = jnp.dot(y, w1_ref[l],
                        preferred_element_type=jnp.float32) + b1_ref[l]
            f = _gelu_exact(f)
            f = jnp.dot(f, w2_ref[l],
                        preferred_element_type=jnp.float32) + b2_ref[l]
            h = _layer_norm(y + f, ln2g_ref[l], ln2b_ref[l])

        # accumulate partial sum over the batch (torch `x.mean(dim=1)`)
        acc_ref[...] += h.reshape(batch_tile, seq_len, d_model).sum(axis=0)

        @pl.when(bt_idx == pl.num_programs(0) - 1)
        def _finalize():
            m = acc_ref[...] * (1.0 / batch_size)                  # (S, D)
            out_ref[...] = (jnp.dot(m, wfc_ref[...],
                                    preferred_element_type=jnp.float32)
                            + bfc_ref[...]).astype(out_ref.dtype)

    return kernel


_WEIGHT_NAMES = ["wq_t", "bq", "wk_t", "bk", "wv_t", "bv", "wo_t", "bo",
                 "ln1_g", "ln1_b", "w1_t", "b1", "w2_t", "b2", "ln2_g", "ln2_b",
                 "wfc_t", "bfc"]


def forward(x, params, num_heads):
    """x: (S, N, E) as in PyTorch (batch_first=False). Returns (S, num_out)."""
    S, B, D = x.shape
    L = params["wq_t"].shape[0]
    d_ff = params["w1_t"].shape[-1]
    num_out = params["wfc_t"].shape[-1]
    head_dim = D // num_heads

    xb = jnp.transpose(x, (1, 0, 2)).reshape(B * S, D)     # batch-major row slab

    bt = _pick_batch_tile(B, S)
    nbt = B // bt

    kernel = make_transformer_kernel(
        num_layers=L, num_heads=num_heads, d_model=D, d_ff=d_ff,
        batch_tile=bt, seq_len=S, batch_size=B, num_out=num_out)

    weights = [params[n] for n in _WEIGHT_NAMES]

    # advisory cost estimate for XLA's scheduler
    R = B * S
    flops = L * (2 * R * D * D * 4                       # q,k,v,out-proj
                 + 2 * B * num_heads * S * S * head_dim * 2   # scores + PV
                 + 2 * R * D * d_ff * 2)                 # FF up + down
    flops += 2 * S * D * num_out                         # final fc
    transcendentals = L * (B * num_heads * S * S + R * d_ff)   # exp + erf
    bytes_accessed = 4 * (xb.size + sum(w.size for w in weights) + S * num_out)

    return pl.pallas_call(
        kernel,
        out_shape=jax.ShapeDtypeStruct((S, num_out), jnp.float32),
        grid=(nbt,),
        in_specs=[pl.BlockSpec((bt * S, D), lambda i: (i, 0))]
                 + [_full_spec(w) for w in weights],
        out_specs=pl.BlockSpec((S, num_out), lambda i: (0, 0)),
        scratch_shapes=[pltpu.VMEM((S, D), jnp.float32)],   # batch-mean accumulator
        compiler_params=pltpu.CompilerParams(
            # batch-mean accumulator is carried across the grid -> "arbitrary".
            # TODO(synk): for v7x megacore, a per-core partial-sum + combine
            # would re-enable a "parallel" batch axis.
            dimension_semantics=("arbitrary",),
            # raise the v5e 16 MiB default scoped-VMEM limit; 32 MiB is the
            # default on v6e/v7x and well within v7x's 64 MiB physical VMEM.
            vmem_limit_bytes=32 * 1024 * 1024),
        cost_estimate=pl.CostEstimate(flops=flops,
                                      transcendentals=transcendentals,
                                      bytes_accessed=bytes_accessed),
    )(xb, *weights)


# ------------------------------- glue / init -------------------------------

def init_params(key, embedding_dim, num_out, num_layers, num_heads, ff_mult):
    d_model = embedding_dim * num_heads
    d_ff = embedding_dim * ff_mult
    per_layer = {k: [] for k in _WEIGHT_NAMES[:-2]}
    for _ in range(num_layers):
        key, kq, kk, kv, ko, k1, k2, kb = jax.random.split(key, 8)
        per_layer["wq_t"].append(jax.random.normal(kq, (d_model, d_model)) * 0.05)
        per_layer["wk_t"].append(jax.random.normal(kk, (d_model, d_model)) * 0.05)
        per_layer["wv_t"].append(jax.random.normal(kv, (d_model, d_model)) * 0.05)
        per_layer["wo_t"].append(jax.random.normal(ko, (d_model, d_model)) * 0.05)
        per_layer["w1_t"].append(jax.random.normal(k1, (d_model, d_ff)) * 0.05)
        per_layer["w2_t"].append(jax.random.normal(k2, (d_ff, d_model)) * 0.05)
        per_layer["bq"].append(jax.random.normal(kb, (1, d_model)) * 0.05)
        per_layer["bk"].append(jnp.zeros((1, d_model)))
        per_layer["bv"].append(jnp.zeros((1, d_model)))
        per_layer["bo"].append(jnp.zeros((1, d_model)))
        per_layer["b1"].append(jnp.zeros((1, d_ff)))
        per_layer["b2"].append(jnp.zeros((1, d_model)))
        per_layer["ln1_g"].append(jnp.ones((1, d_model)))
        per_layer["ln1_b"].append(jnp.zeros((1, d_model)))
        per_layer["ln2_g"].append(jnp.ones((1, d_model)))
        per_layer["ln2_b"].append(jnp.zeros((1, d_model)))
    params = {k: jnp.stack(v).astype(jnp.float32) for k, v in per_layer.items()}
    key, kf, kb2 = jax.random.split(key, 3)
    params["wfc_t"] = (jax.random.normal(kf, (embedding_dim, num_out)) * 0.05
                       ).astype(jnp.float32)
    params["bfc"] = (jax.random.normal(kb2, (1, num_out)) * 0.05
                     ).astype(jnp.float32)
    return params


def forward_ref(x, params, num_heads):
    """Pure-JAX reference with identical math (sanity check)."""
    S, B, D = x.shape
    hd = D // num_heads
    scale = 1.0 / math.sqrt(hd)
    h = jnp.transpose(x, (1, 0, 2))                        # (B, S, D)
    L = params["wq_t"].shape[0]

    def ln(v, g, b):
        mu = v.mean(-1, keepdims=True)
        var = ((v - mu) ** 2).mean(-1, keepdims=True)
        return (v - mu) / jnp.sqrt(var + 1e-5) * g + b

    for l in range(L):
        q = jnp.einsum("bsd,df->bsf", h, params["wq_t"][l],
                       precision="highest") + params["bq"][l]
        k = jnp.einsum("bsd,df->bsf", h, params["wk_t"][l],
                       precision="highest") + params["bk"][l]
        v = jnp.einsum("bsd,df->bsf", h, params["wv_t"][l],
                       precision="highest") + params["bv"][l]
        q = q.reshape(B, S, num_heads, hd) * scale
        k = k.reshape(B, S, num_heads, hd)
        v = v.reshape(B, S, num_heads, hd)
        s = jnp.einsum("bqhd,bkhd->bhqk", q, k, precision="highest")
        p = jax.nn.softmax(s, axis=-1)
        a = jnp.einsum("bhqk,bkhd->bqhd", p, v,
                       precision="highest").reshape(B, S, D)
        a = jnp.einsum("bsd,df->bsf", a, params["wo_t"][l],
                       precision="highest") + params["bo"][l]
        y = ln(h + a, params["ln1_g"][l], params["ln1_b"][l])
        f = jnp.einsum("bsd,df->bsf", y, params["w1_t"][l],
                       precision="highest") + params["b1"][l]
        f = 0.5 * f * (1.0 + jax.lax.erf(f * 0.7071067811865476))
        f = jnp.einsum("bsf,fd->bsd", f, params["w2_t"][l],
                       precision="highest") + params["b2"][l]
        h = ln(y + f, params["ln2_g"][l], params["ln2_b"][l])
    m = h.mean(axis=0)                                     # torch mean(dim=1)
    return jnp.einsum("sd,do->so", m, params["wfc_t"],
                      precision="highest") + params["bfc"][0]


if __name__ == "__main__":
    # TODO(synk): the original module's fc has in_features=embedding_dim while the
    # transformer outputs embedding_dim*num_heads features; the forward only runs
    # for num_heads=1, so the example uses num_heads=1 (kernels support general
    # num_heads via the head-batched attention path).
    embedding_dim, num_out = 32, 8
    num_layers, num_heads, ff_mult = 2, 1, 2
    S, B = 8, 2
    d_model = embedding_dim * num_heads

    key = jax.random.PRNGKey(0)
    kx, kp = jax.random.split(key)
    x = jax.random.normal(kx, (S, B, d_model), jnp.float32)   # (seq, batch, d_model)
    params = init_params(kp, embedding_dim, num_out, num_layers, num_heads, ff_mult)

    out = jax.block_until_ready(forward(x, params, num_heads))
    ref = forward_ref(x, params, num_heads)
    # tolerance allows for the approx (EUP) softmax reciprocal in the kernel
    np.testing.assert_allclose(np.asarray(out), np.asarray(ref),
                               atol=1e-2, rtol=1e-2)
    print("KERNEL_OK")
</pallas_src>

<mosaic_0001>
module attributes {stable_mosaic.version = 11 : i64} {
  func.func @kernel(%arg0: i32, %arg1: memref<16x32xf32, #tpu.memory_space<vmem>>, %arg2: memref<2x32x32xf32, #tpu.memory_space<vmem>>, %arg3: memref<2x1x32xf32, #tpu.memory_space<vmem>>, %arg4: memref<2x32x32xf32, #tpu.memory_space<vmem>>, %arg5: memref<2x1x32xf32, #tpu.memory_space<vmem>>, %arg6: memref<2x32x32xf32, #tpu.memory_space<vmem>>, %arg7: memref<2x1x32xf32, #tpu.memory_space<vmem>>, %arg8: memref<2x32x32xf32, #tpu.memory_space<vmem>>, %arg9: memref<2x1x32xf32, #tpu.memory_space<vmem>>, %arg10: memref<2x1x32xf32, #tpu.memory_space<vmem>>, %arg11: memref<2x1x32xf32, #tpu.memory_space<vmem>>, %arg12: memref<2x32x64xf32, #tpu.memory_space<vmem>>, %arg13: memref<2x1x64xf32, #tpu.memory_space<vmem>>, %arg14: memref<2x64x32xf32, #tpu.memory_space<vmem>>, %arg15: memref<2x1x32xf32, #tpu.memory_space<vmem>>, %arg16: memref<2x1x32xf32, #tpu.memory_space<vmem>>, %arg17: memref<2x1x32xf32, #tpu.memory_space<vmem>>, %arg18: memref<32x8xf32, #tpu.memory_space<vmem>>, %arg19: memref<1x8xf32, #tpu.memory_space<vmem>>, %arg20: memref<8x8xf32, #tpu.memory_space<vmem>>, %arg21: memref<8x32xf32, #tpu.memory_space<vmem>>) attributes {dimension_semantics = [#tpu.dimension_semantics<arbitrary>], iteration_bounds = array<i64: 1>, scalar_prefetch = 0 : i64, scratch_operands = 1 : i64, tpu.core_type = #tpu.core_type<tc>, window_params = [{transform_indices = @transform_0, window_bounds = array<i64: 16, 32>}, {pipeline_mode = #tpu.pipeline_mode<synchronous>, transform_indices = @transform_1, window_bounds = array<i64: 2, 32, 32>}, {pipeline_mode = #tpu.pipeline_mode<synchronous>, transform_indices = @transform_2, window_bounds = array<i64: 2, 1, 32>}, {pipeline_mode = #tpu.pipeline_mode<synchronous>, transform_indices = @transform_3, window_bounds = array<i64: 2, 32, 32>}, {pipeline_mode = #tpu.pipeline_mode<synchronous>, transform_indices = @transform_4, window_bounds = array<i64: 2, 1, 32>}, {pipeline_mode = #tpu.pipeline_mode<synchronous>, transform_indices = @transform_5, window_bounds = array<i64: 2, 32, 32>}, {pipeline_mode = #tpu.pipeline_mode<synchronous>, transform_indices = @transform_6, window_bounds = array<i64: 2, 1, 32>}, {pipeline_mode = #tpu.pipeline_mode<synchronous>, transform_indices = @transform_7, window_bounds = array<i64: 2, 32, 32>}, {pipeline_mode = #tpu.pipeline_mode<synchronous>, transform_indices = @transform_8, window_bounds = array<i64: 2, 1, 32>}, {pipeline_mode = #tpu.pipeline_mode<synchronous>, transform_indices = @transform_9, window_bounds = array<i64: 2, 1, 32>}, {pipeline_mode = #tpu.pipeline_mode<synchronous>, transform_indices = @transform_10, window_bounds = array<i64: 2, 1, 32>}, {pipeline_mode = #tpu.pipeline_mode<synchronous>, transform_indices = @transform_11, window_bounds = array<i64: 2, 32, 64>}, {pipeline_mode = #tpu.pipeline_mode<synchronous>, transform_indices = @transform_12, window_bounds = array<i64: 2, 1, 64>}, {pipeline_mode = #tpu.pipeline_mode<synchronous>, transform_indices = @transform_13, window_bounds = array<i64: 2, 64, 32>}, {pipeline_mode = #tpu.pipeline_mode<synchronous>, transform_indices = @transform_14, window_bounds = array<i64: 2, 1, 32>}, {pipeline_mode = #tpu.pipeline_mode<synchronous>, transform_indices = @transform_15, window_bounds = array<i64: 2, 1, 32>}, {pipeline_mode = #tpu.pipeline_mode<synchronous>, transform_indices = @transform_16, window_bounds = array<i64: 2, 1, 32>}, {pipeline_mode = #tpu.pipeline_mode<synchronous>, transform_indices = @transform_17, window_bounds = array<i64: 32, 8>}, {pipeline_mode = #tpu.pipeline_mode<synchronous>, transform_indices = @transform_18, window_bounds = array<i64: 1, 8>}, {pipeline_mode = #tpu.pipeline_mode<synchronous>, transform_indices = @transform_19, window_bounds = array<i64: 8, 8>}]} {
    %c0_i32 = arith.constant 0 : i32
    %0 = arith.cmpi eq, %arg0, %c0_i32 : i32
    %1 = arith.extui %0 : i1 to i32
    %c0_i32_0 = arith.constant 0 : i32
    %2 = arith.cmpi ne, %1, %c0_i32_0 : i32
    scf.if %2 {
      %cst_151 = arith.constant 0.000000e+00 : f32
      %256 = vector.broadcast %cst_151 : f32 to vector<8x32xf32>
      %c0_152 = arith.constant 0 : index
      %c0_153 = arith.constant 0 : index
      %257 = vector.load %arg21[%c0_152, %c0_153] : memref<8x32xf32, #tpu.memory_space<vmem>>, vector<8x32xf32>
      tpu.vector_store %arg21[%c0_152, %c0_153], %256 {strides = array<i32>} : memref<8x32xf32, #tpu.memory_space<vmem>>, vector<8x32xf32>,
    } else {
    }
    %c0 = arith.constant 0 : index
    %c0_1 = arith.constant 0 : index
    %3 = vector.load %arg1[%c0, %c0_1] : memref<16x32xf32, #tpu.memory_space<vmem>>, vector<16x32xf32>
    %c0_2 = arith.constant 0 : index
    %c0_3 = arith.constant 0 : index
    %c0_4 = arith.constant 0 : index
    %4 = vector.load %arg2[%c0_2, %c0_3, %c0_4] : memref<2x32x32xf32, #tpu.memory_space<vmem>>, vector<1x32x32xf32>
    %5 = vector.shape_cast %4 : vector<1x32x32xf32> to vector<32x32xf32>
    %cst = arith.constant dense<0.000000e+00> : vector<16x32xf32>
    %6 = tpu.matmul %3, %5, %cst {dimension_numbers = #tpu.dot_dimension_numbers<[1], [0], [0], [1], [0, 0, 1, 1], [], []>} : vector<16x32xf32>, vector<32x32xf32>, vector<16x32xf32> -> vector<16x32xf32>
    %c0_5 = arith.constant 0 : index
    %c0_6 = arith.constant 0 : index
    %c0_7 = arith.constant 0 : index
    %7 = vector.load %arg3[%c0_5, %c0_6, %c0_7] : memref<2x1x32xf32, #tpu.memory_space<vmem>>, vector<1x1x32xf32>
    %8 = vector.shape_cast %7 : vector<1x1x32xf32> to vector<1x32xf32>
    %9 = vector.broadcast %8 : vector<1x32xf32> to vector<16x32xf32>
    %10 = arith.addf %6, %9 : vector<16x32xf32>
    %c0_8 = arith.constant 0 : index
    %c0_9 = arith.constant 0 : index
    %c0_10 = arith.constant 0 : index
    %11 = vector.load %arg4[%c0_8, %c0_9, %c0_10] : memref<2x32x32xf32, #tpu.memory_space<vmem>>, vector<1x32x32xf32>
    %12 = vector.shape_cast %11 : vector<1x32x32xf32> to vector<32x32xf32>
    %cst_11 = arith.constant dense<0.000000e+00> : vector<16x32xf32>
    %13 = tpu.matmul %3, %12, %cst_11 {dimension_numbers = #tpu.dot_dimension_numbers<[1], [0], [0], [1], [0, 0, 1, 1], [], []>} : vector<16x32xf32>, vector<32x32xf32>, vector<16x32xf32> -> vector<16x32xf32>
    %c0_12 = arith.constant 0 : index
    %c0_13 = arith.constant 0 : index
    %c0_14 = arith.constant 0 : index
    %14 = vector.load %arg5[%c0_12, %c0_13, %c0_14] : memref<2x1x32xf32, #tpu.memory_space<vmem>>, vector<1x1x32xf32>
    %15 = vector.shape_cast %14 : vector<1x1x32xf32> to vector<1x32xf32>
    %16 = vector.broadcast %15 : vector<1x32xf32> to vector<16x32xf32>
    %17 = arith.addf %13, %16 : vector<16x32xf32>
    %c0_15 = arith.constant 0 : index
    %c0_16 = arith.constant 0 : index
    %c0_17 = arith.constant 0 : index
    %18 = vector.load %arg6[%c0_15, %c0_16, %c0_17] : memref<2x32x32xf32, #tpu.memory_space<vmem>>, vector<1x32x32xf32>
    %19 = vector.shape_cast %18 : vector<1x32x32xf32> to vector<32x32xf32>
    %cst_18 = arith.constant dense<0.000000e+00> : vector<16x32xf32>
    %20 = tpu.matmul %3, %19, %cst_18 {dimension_numbers = #tpu.dot_dimension_numbers<[1], [0], [0], [1], [0, 0, 1, 1], [], []>} : vector<16x32xf32>, vector<32x32xf32>, vector<16x32xf32> -> vector<16x32xf32>
    %c0_19 = arith.constant 0 : index
    %c0_20 = arith.constant 0 : index
    %c0_21 = arith.constant 0 : index
    %21 = vector.load %arg7[%c0_19, %c0_20, %c0_21] : memref<2x1x32xf32, #tpu.memory_space<vmem>>, vector<1x1x32xf32>
    %22 = vector.shape_cast %21 : vector<1x1x32xf32> to vector<1x32xf32>
    %23 = vector.broadcast %22 : vector<1x32xf32> to vector<16x32xf32>
    %24 = arith.addf %20, %23 : vector<16x32xf32>
    %25 = vector.shape_cast %10 : vector<16x32xf32> to vector<2x8x32xf32>
    %cst_22 = arith.constant 0.176776692 : f32
    %26 = vector.broadcast %cst_22 : f32 to vector<2x8x32xf32>
    %27 = arith.mulf %25, %26 : vector<2x8x32xf32>
    %28 = vector.shape_cast %17 : vector<16x32xf32> to vector<2x8x32xf32>
    %29 = vector.shape_cast %24 : vector<16x32xf32> to vector<2x8x32xf32>
    "tpu.trace_start"() <{level = 10 : i32, message = "bqd,bkd->bqk"}> : () -> ()
    %cst_23 = arith.constant dense<0.000000e+00> : vector<2x8x8xf32>
    %30 = tpu.matmul %27, %28, %cst_23 {dimension_numbers = #tpu.dot_dimension_numbers<[2], [2], [1], [1], [0, 0, 0, 1, 1, 1], [0], [0]>} : vector<2x8x32xf32>, vector<2x8x32xf32>, vector<2x8x8xf32> -> vector<2x8x8xf32>
    "tpu.trace_stop"() : () -> ()
    %cst_24 = arith.constant dense<0xFF800000> : vector<2x8xf32>
    %31 = vector.multi_reduction <maximumf>, %30, %cst_24 [2] : vector<2x8x8xf32> to vector<2x8xf32>
    %32 = vector.shape_cast %31 : vector<2x8xf32> to vector<2x8x1xf32>
    %33 = vector.broadcast %32 : vector<2x8x1xf32> to vector<2x8x8xf32>
    %34 = arith.subf %30, %33 : vector<2x8x8xf32>
    %35 = math.exp %34 : vector<2x8x8xf32>
    %cst_25 = arith.constant dense<0.000000e+00> : vector<2x8xf32>
    %36 = vector.multi_reduction <add>, %35, %cst_25 [2] : vector<2x8x8xf32> to vector<2x8xf32>
    %37 = vector.shape_cast %36 : vector<2x8xf32> to vector<2x8x1xf32>
    %38 = tpu.reciprocal %37 {approx = true} : vector<2x8x1xf32> -> vector<2x8x1xf32>
    %39 = vector.broadcast %38 : vector<2x8x1xf32> to vector<2x8x8xf32>
    %40 = arith.mulf %35, %39 : vector<2x8x8xf32>
    "tpu.trace_start"() <{level = 10 : i32, message = "bqk,bkd->bqd"}> : () -> ()
    %cst_26 = arith.constant dense<0.000000e+00> : vector<2x8x32xf32>
    %41 = tpu.matmul %40, %29, %cst_26 {dimension_numbers = #tpu.dot_dimension_numbers<[2], [1], [1], [2], [0, 0, 0, 1, 1, 2], [0], [0]>} : vector<2x8x8xf32>, vector<2x8x32xf32>, vector<2x8x32xf32> -> vector<2x8x32xf32>
    "tpu.trace_stop"() : () -> ()
    %42 = vector.shape_cast %41 : vector<2x8x32xf32> to vector<16x32xf32>
    %c0_27 = arith.constant 0 : index
    %c0_28 = arith.constant 0 : index
    %c0_29 = arith.constant 0 : index
    %43 = vector.load %arg8[%c0_27, %c0_28, %c0_29] : memref<2x32x32xf32, #tpu.memory_space<vmem>>, vector<1x32x32xf32>
    %44 = vector.shape_cast %43 : vector<1x32x32xf32> to vector<32x32xf32>
    %cst_30 = arith.constant dense<0.000000e+00> : vector<16x32xf32>
    %45 = tpu.matmul %42, %44, %cst_30 {dimension_numbers = #tpu.dot_dimension_numbers<[1], [0], [0], [1], [0, 0, 1, 1], [], []>} : vector<16x32xf32>, vector<32x32xf32>, vector<16x32xf32> -> vector<16x32xf32>
    %c0_31 = arith.constant 0 : index
    %c0_32 = arith.constant 0 : index
    %c0_33 = arith.constant 0 : index
    %46 = vector.load %arg9[%c0_31, %c0_32, %c0_33] : memref<2x1x32xf32, #tpu.memory_space<vmem>>, vector<1x1x32xf32>
    %47 = vector.shape_cast %46 : vector<1x1x32xf32> to vector<1x32xf32>
    %48 = vector.broadcast %47 : vector<1x32xf32> to vector<16x32xf32>
    %49 = arith.addf %45, %48 : vector<16x32xf32>
    %50 = arith.addf %3, %49 : vector<16x32xf32>
    %c0_34 = arith.constant 0 : index
    %c0_35 = arith.constant 0 : index
    %c0_36 = arith.constant 0 : index
    %51 = vector.load %arg10[%c0_34, %c0_35, %c0_36] : memref<2x1x32xf32, #tpu.memory_space<vmem>>, vector<1x1x32xf32>
    %52 = vector.shape_cast %51 : vector<1x1x32xf32> to vector<1x32xf32>
    %c0_37 = arith.constant 0 : index
    %c0_38 = arith.constant 0 : index
    %c0_39 = arith.constant 0 : index
    %53 = vector.load %arg11[%c0_37, %c0_38, %c0_39] : memref<2x1x32xf32, #tpu.memory_space<vmem>>, vector<1x1x32xf32>
    %54 = vector.shape_cast %53 : vector<1x1x32xf32> to vector<1x32xf32>
    %cst_40 = arith.constant dense<0.000000e+00> : vector<16xf32>
    %55 = vector.multi_reduction <add>, %50, %cst_40 [1] : vector<16x32xf32> to vector<16xf32>
    %56 = vector.shape_cast %55 : vector<16xf32> to vector<16x1xf32>
    %cst_41 = arith.constant 3.200000e+01 : f32
    %57 = vector.broadcast %cst_41 : f32 to vector<16x1xf32>
    %58 = arith.divf %56, %57 : vector<16x1xf32>
    %59 = vector.broadcast %58 : vector<16x1xf32> to vector<16x32xf32>
    %60 = arith.subf %50, %59 : vector<16x32xf32>
    %61 = arith.mulf %60, %60 : vector<16x32xf32>
    %cst_42 = arith.constant dense<0.000000e+00> : vector<16xf32>
    %62 = vector.multi_reduction <add>, %61, %cst_42 [1] : vector<16x32xf32> to vector<16xf32>
    %63 = vector.shape_cast %62 : vector<16xf32> to vector<16x1xf32>
    %cst_43 = arith.constant 3.200000e+01 : f32
    %64 = vector.broadcast %cst_43 : f32 to vector<16x1xf32>
    %65 = arith.divf %63, %64 : vector<16x1xf32>
    %66 = vector.broadcast %58 : vector<16x1xf32> to vector<16x32xf32>
    %67 = arith.subf %50, %66 : vector<16x32xf32>
    %cst_44 = arith.constant 9.99999974E-6 : f32
    %68 = vector.broadcast %cst_44 : f32 to vector<16x1xf32>
    %69 = arith.addf %65, %68 : vector<16x1xf32>
    %70 = math.rsqrt %69 : vector<16x1xf32>
    %71 = vector.broadcast %70 : vector<16x1xf32> to vector<16x32xf32>
    %72 = arith.mulf %67, %71 : vector<16x32xf32>
    %73 = vector.broadcast %52 : vector<1x32xf32> to vector<16x32xf32>
    %74 = arith.mulf %72, %73 : vector<16x32xf32>
    %75 = vector.broadcast %54 : vector<1x32xf32> to vector<16x32xf32>
    %76 = arith.addf %74, %75 : vector<16x32xf32>
    %c0_45 = arith.constant 0 : index
    %c0_46 = arith.constant 0 : index
    %c0_47 = arith.constant 0 : index
    %77 = vector.load %arg12[%c0_45, %c0_46, %c0_47] : memref<2x32x64xf32, #tpu.memory_space<vmem>>, vector<1x32x64xf32>
    %78 = vector.shape_cast %77 : vector<1x32x64xf32> to vector<32x64xf32>
    %cst_48 = arith.constant dense<0.000000e+00> : vector<16x64xf32>
    %79 = tpu.matmul %76, %78, %cst_48 {dimension_numbers = #tpu.dot_dimension_numbers<[1], [0], [0], [1], [0, 0, 1, 1], [], []>} : vector<16x32xf32>, vector<32x64xf32>, vector<16x64xf32> -> vector<16x64xf32>
    %c0_49 = arith.constant 0 : index
    %c0_50 = arith.constant 0 : index
    %c0_51 = arith.constant 0 : index
    %80 = vector.load %arg13[%c0_49, %c0_50, %c0_51] : memref<2x1x64xf32, #tpu.memory_space<vmem>>, vector<1x1x64xf32>
    %81 = vector.shape_cast %80 : vector<1x1x64xf32> to vector<1x64xf32>
    %82 = vector.broadcast %81 : vector<1x64xf32> to vector<16x64xf32>
    %83 = arith.addf %79, %82 : vector<16x64xf32>
    %cst_52 = arith.constant 5.000000e-01 : f32
    %84 = vector.broadcast %cst_52 : f32 to vector<16x64xf32>
    %85 = arith.mulf %84, %83 : vector<16x64xf32>
    %cst_53 = arith.constant 0.707106769 : f32
    %86 = vector.broadcast %cst_53 : f32 to vector<16x64xf32>
    %87 = arith.mulf %83, %86 : vector<16x64xf32>
    %88 = math.erf %87 : vector<16x64xf32>
    %cst_54 = arith.constant 1.000000e+00 : f32
    %89 = vector.broadcast %cst_54 : f32 to vector<16x64xf32>
    %90 = arith.addf %89, %88 : vector<16x64xf32>
    %91 = arith.mulf %85, %90 : vector<16x64xf32>
    %c0_55 = arith.constant 0 : index
    %c0_56 = arith.constant 0 : index
    %c0_57 = arith.constant 0 : index
    %92 = vector.load %arg14[%c0_55, %c0_56, %c0_57] : memref<2x64x32xf32, #tpu.memory_space<vmem>>, vector<1x64x32xf32>
    %93 = vector.shape_cast %92 : vector<1x64x32xf32> to vector<64x32xf32>
    %cst_58 = arith.constant dense<0.000000e+00> : vector<16x32xf32>
    %94 = tpu.matmul %91, %93, %cst_58 {dimension_numbers = #tpu.dot_dimension_numbers<[1], [0], [0], [1], [0, 0, 1, 1], [], []>} : vector<16x64xf32>, vector<64x32xf32>, vector<16x32xf32> -> vector<16x32xf32>
    %c0_59 = arith.constant 0 : index
    %c0_60 = arith.constant 0 : index
    %c0_61 = arith.constant 0 : index
    %95 = vector.load %arg15[%c0_59, %c0_60, %c0_61] : memref<2x1x32xf32, #tpu.memory_space<vmem>>, vector<1x1x32xf32>
    %96 = vector.shape_cast %95 : vector<1x1x32xf32> to vector<1x32xf32>
    %97 = vector.broadcast %96 : vector<1x32xf32> to vector<16x32xf32>
    %98 = arith.addf %94, %97 : vector<16x32xf32>
    %99 = arith.addf %76, %98 : vector<16x32xf32>
    %c0_62 = arith.constant 0 : index
    %c0_63 = arith.constant 0 : index
    %c0_64 = arith.constant 0 : index
    %100 = vector.load %arg16[%c0_62, %c0_63, %c0_64] : memref<2x1x32xf32, #tpu.memory_space<vmem>>, vector<1x1x32xf32>
    %101 = vector.shape_cast %100 : vector<1x1x32xf32> to vector<1x32xf32>
    %c0_65 = arith.constant 0 : index
    %c0_66 = arith.constant 0 : index
    %c0_67 = arith.constant 0 : index
    %102 = vector.load %arg17[%c0_65, %c0_66, %c0_67] : memref<2x1x32xf32, #tpu.memory_space<vmem>>, vector<1x1x32xf32>
    %103 = vector.shape_cast %102 : vector<1x1x32xf32> to vector<1x32xf32>
    %cst_68 = arith.constant dense<0.000000e+00> : vector<16xf32>
    %104 = vector.multi_reduction <add>, %99, %cst_68 [1] : vector<16x32xf32> to vector<16xf32>
    %105 = vector.shape_cast %104 : vector<16xf32> to vector<16x1xf32>
    %cst_69 = arith.constant 3.200000e+01 : f32
    %106 = vector.broadcast %cst_69 : f32 to vector<16x1xf32>
    %107 = arith.divf %105, %106 : vector<16x1xf32>
    %108 = vector.broadcast %107 : vector<16x1xf32> to vector<16x32xf32>
    %109 = arith.subf %99, %108 : vector<16x32xf32>
    %110 = arith.mulf %109, %109 : vector<16x32xf32>
    %cst_70 = arith.constant dense<0.000000e+00> : vector<16xf32>
    %111 = vector.multi_reduction <add>, %110, %cst_70 [1] : vector<16x32xf32> to vector<16xf32>
    %112 = vector.shape_cast %111 : vector<16xf32> to vector<16x1xf32>
    %cst_71 = arith.constant 3.200000e+01 : f32
    %113 = vector.broadcast %cst_71 : f32 to vector<16x1xf32>
    %114 = arith.divf %112, %113 : vector<16x1xf32>
    %115 = vector.broadcast %107 : vector<16x1xf32> to vector<16x32xf32>
    %116 = arith.subf %99, %115 : vector<16x32xf32>
    %cst_72 = arith.constant 9.99999974E-6 : f32
    %117 = vector.broadcast %cst_72 : f32 to vector<16x1xf32>
    %118 = arith.addf %114, %117 : vector<16x1xf32>
    %119 = math.rsqrt %118 : vector<16x1xf32>
    %120 = vector.broadcast %119 : vector<16x1xf32> to vector<16x32xf32>
    %121 = arith.mulf %116, %120 : vector<16x32xf32>
    %122 = vector.broadcast %101 : vector<1x32xf32> to vector<16x32xf32>
    %123 = arith.mulf %121, %122 : vector<16x32xf32>
    %124 = vector.broadcast %103 : vector<1x32xf32> to vector<16x32xf32>
    %125 = arith.addf %123, %124 : vector<16x32xf32>
    %c1 = arith.constant 1 : index
    %c0_73 = arith.constant 0 : index
    %c0_74 = arith.constant 0 : index
    %126 = vector.load %arg2[%c1, %c0_73, %c0_74] : memref<2x32x32xf32, #tpu.memory_space<vmem>>, vector<1x32x32xf32>
    %127 = vector.shape_cast %126 : vector<1x32x32xf32> to vector<32x32xf32>
    %cst_75 = arith.constant dense<0.000000e+00> : vector<16x32xf32>
    %128 = tpu.matmul %125, %127, %cst_75 {dimension_numbers = #tpu.dot_dimension_numbers<[1], [0], [0], [1], [0, 0, 1, 1], [], []>} : vector<16x32xf32>, vector<32x32xf32>, vector<16x32xf32> -> vector<16x32xf32>
    %c1_76 = arith.constant 1 : index
    %c0_77 = arith.constant 0 : index
    %c0_78 = arith.constant 0 : index
    %129 = vector.load %arg3[%c1_76, %c0_77, %c0_78] : memref<2x1x32xf32, #tpu.memory_space<vmem>>, vector<1x1x32xf32>
    %130 = vector.shape_cast %129 : vector<1x1x32xf32> to vector<1x32xf32>
    %131 = vector.broadcast %130 : vector<1x32xf32> to vector<16x32xf32>
    %132 = arith.addf %128, %131 : vector<16x32xf32>
    %c1_79 = arith.constant 1 : index
    %c0_80 = arith.constant 0 : index
    %c0_81 = arith.constant 0 : index
    %133 = vector.load %arg4[%c1_79, %c0_80, %c0_81] : memref<2x32x32xf32, #tpu.memory_space<vmem>>, vector<1x32x32xf32>
    %134 = vector.shape_cast %133 : vector<1x32x32xf32> to vector<32x32xf32>
    %cst_82 = arith.constant dense<0.000000e+00> : vector<16x32xf32>
    %135 = tpu.matmul %125, %134, %cst_82 {dimension_numbers = #tpu.dot_dimension_numbers<[1], [0], [0], [1], [0, 0, 1, 1], [], []>} : vector<16x32xf32>, vector<32x32xf32>, vector<16x32xf32> -> vector<16x32xf32>
    %c1_83 = arith.constant 1 : index
    %c0_84 = arith.constant 0 : index
    %c0_85 = arith.constant 0 : index
    %136 = vector.load %arg5[%c1_83, %c0_84, %c0_85] : memref<2x1x32xf32, #tpu.memory_space<vmem>>, vector<1x1x32xf32>
    %137 = vector.shape_cast %136 : vector<1x1x32xf32> to vector<1x32xf32>
    %138 = vector.broadcast %137 : vector<1x32xf32> to vector<16x32xf32>
    %139 = arith.addf %135, %138 : vector<16x32xf32>
    %c1_86 = arith.constant 1 : index
    %c0_87 = arith.constant 0 : index
    %c0_88 = arith.constant 0 : index
    %140 = vector.load %arg6[%c1_86, %c0_87, %c0_88] : memref<2x32x32xf32, #tpu.memory_space<vmem>>, vector<1x32x32xf32>
    %141 = vector.shape_cast %140 : vector<1x32x32xf32> to vector<32x32xf32>
    %cst_89 = arith.constant dense<0.000000e+00> : vector<16x32xf32>
    %142 = tpu.matmul %125, %141, %cst_89 {dimension_numbers = #tpu.dot_dimension_numbers<[1], [0], [0], [1], [0, 0, 1, 1], [], []>} : vector<16x32xf32>, vector<32x32xf32>, vector<16x32xf32> -> vector<16x32xf32>
    %c1_90 = arith.constant 1 : index
    %c0_91 = arith.constant 0 : index
    %c0_92 = arith.constant 0 : index
    %143 = vector.load %arg7[%c1_90, %c0_91, %c0_92] : memref<2x1x32xf32, #tpu.memory_space<vmem>>, vector<1x1x32xf32>
    %144 = vector.shape_cast %143 : vector<1x1x32xf32> to vector<1x32xf32>
    %145 = vector.broadcast %144 : vector<1x32xf32> to vector<16x32xf32>
    %146 = arith.addf %142, %145 : vector<16x32xf32>
    %147 = vector.shape_cast %132 : vector<16x32xf32> to vector<2x8x32xf32>
    %cst_93 = arith.constant 0.176776692 : f32
    %148 = vector.broadcast %cst_93 : f32 to vector<2x8x32xf32>
    %149 = arith.mulf %147, %148 : vector<2x8x32xf32>
    %150 = vector.shape_cast %139 : vector<16x32xf32> to vector<2x8x32xf32>
    %151 = vector.shape_cast %146 : vector<16x32xf32> to vector<2x8x32xf32>
    "tpu.trace_start"() <{level = 10 : i32, message = "bqd,bkd->bqk"}> : () -> ()
    %cst_94 = arith.constant dense<0.000000e+00> : vector<2x8x8xf32>
    %152 = tpu.matmul %149, %150, %cst_94 {dimension_numbers = #tpu.dot_dimension_numbers<[2], [2], [1], [1], [0, 0, 0, 1, 1, 1], [0], [0]>} : vector<2x8x32xf32>, vector<2x8x32xf32>, vector<2x8x8xf32> -> vector<2x8x8xf32>
    "tpu.trace_stop"() : () -> ()
    %cst_95 = arith.constant dense<0xFF800000> : vector<2x8xf32>
    %153 = vector.multi_reduction <maximumf>, %152, %cst_95 [2] : vector<2x8x8xf32> to vector<2x8xf32>
    %154 = vector.shape_cast %153 : vector<2x8xf32> to vector<2x8x1xf32>
    %155 = vector.broadcast %154 : vector<2x8x1xf32> to vector<2x8x8xf32>
    %156 = arith.subf %152, %155 : vector<2x8x8xf32>
    %157 = math.exp %156 : vector<2x8x8xf32>
    %cst_96 = arith.constant dense<0.000000e+00> : vector<2x8xf32>
    %158 = vector.multi_reduction <add>, %157, %cst_96 [2] : vector<2x8x8xf32> to vector<2x8xf32>
    %159 = vector.shape_cast %158 : vector<2x8xf32> to vector<2x8x1xf32>
    %160 = tpu.reciprocal %159 {approx = true} : vector<2x8x1xf32> -> vector<2x8x1xf32>
    %161 = vector.broadcast %160 : vector<2x8x1xf32> to vector<2x8x8xf32>
    %162 = arith.mulf %157, %161 : vector<2x8x8xf32>
    "tpu.trace_start"() <{level = 10 : i32, message = "bqk,bkd->bqd"}> : () -> ()
    %cst_97 = arith.constant dense<0.000000e+00> : vector<2x8x32xf32>
    %163 = tpu.matmul %162, %151, %cst_97 {dimension_numbers = #tpu.dot_dimension_numbers<[2], [1], [1], [2], [0, 0, 0, 1, 1, 2], [0], [0]>} : vector<2x8x8xf32>, vector<2x8x32xf32>, vector<2x8x32xf32> -> vector<2x8x32xf32>
    "tpu.trace_stop"() : () -> ()
    %164 = vector.shape_cast %163 : vector<2x8x32xf32> to vector<16x32xf32>
    %c1_98 = arith.constant 1 : index
    %c0_99 = arith.constant 0 : index
    %c0_100 = arith.constant 0 : index
    %165 = vector.load %arg8[%c1_98, %c0_99, %c0_100] : memref<2x32x32xf32, #tpu.memory_space<vmem>>, vector<1x32x32xf32>
    %166 = vector.shape_cast %165 : vector<1x32x32xf32> to vector<32x32xf32>
    %cst_101 = arith.constant dense<0.000000e+00> : vector<16x32xf32>
    %167 = tpu.matmul %164, %166, %cst_101 {dimension_numbers = #tpu.dot_dimension_numbers<[1], [0], [0], [1], [0, 0, 1, 1], [], []>} : vector<16x32xf32>, vector<32x32xf32>, vector<16x32xf32> -> vector<16x32xf32>
    %c1_102 = arith.constant 1 : index
    %c0_103 = arith.constant 0 : index
    %c0_104 = arith.constant 0 : index
    %168 = vector.load %arg9[%c1_102, %c0_103, %c0_104] : memref<2x1x32xf32, #tpu.memory_space<vmem>>, vector<1x1x32xf32>
    %169 = vector.shape_cast %168 : vector<1x1x32xf32> to vector<1x32xf32>
    %170 = vector.broadcast %169 : vector<1x32xf32> to vector<16x32xf32>
    %171 = arith.addf %167, %170 : vector<16x32xf32>
    %172 = arith.addf %125, %171 : vector<16x32xf32>
    %c1_105 = arith.constant 1 : index
    %c0_106 = arith.constant 0 : index
    %c0_107 = arith.constant 0 : index
    %173 = vector.load %arg10[%c1_105, %c0_106, %c0_107] : memref<2x1x32xf32, #tpu.memory_space<vmem>>, vector<1x1x32xf32>
    %174 = vector.shape_cast %173 : vector<1x1x32xf32> to vector<1x32xf32>
    %c1_108 = arith.constant 1 : index
    %c0_109 = arith.constant 0 : index
    %c0_110 = arith.constant 0 : index
    %175 = vector.load %arg11[%c1_108, %c0_109, %c0_110] : memref<2x1x32xf32, #tpu.memory_space<vmem>>, vector<1x1x32xf32>
    %176 = vector.shape_cast %175 : vector<1x1x32xf32> to vector<1x32xf32>
    %cst_111 = arith.constant dense<0.000000e+00> : vector<16xf32>
    %177 = vector.multi_reduction <add>, %172, %cst_111 [1] : vector<16x32xf32> to vector<16xf32>
    %178 = vector.shape_cast %177 : vector<16xf32> to vector<16x1xf32>
    %cst_112 = arith.constant 3.200000e+01 : f32
    %179 = vector.broadcast %cst_112 : f32 to vector<16x1xf32>
    %180 = arith.divf %178, %179 : vector<16x1xf32>
    %181 = vector.broadcast %180 : vector<16x1xf32> to vector<16x32xf32>
    %182 = arith.subf %172, %181 : vector<16x32xf32>
    %183 = arith.mulf %182, %182 : vector<16x32xf32>
    %cst_113 = arith.constant dense<0.000000e+00> : vector<16xf32>
    %184 = vector.multi_reduction <add>, %183, %cst_113 [1] : vector<16x32xf32> to vector<16xf32>
    %185 = vector.shape_cast %184 : vector<16xf32> to vector<16x1xf32>
    %cst_114 = arith.constant 3.200000e+01 : f32
    %186 = vector.broadcast %cst_114 : f32 to vector<16x1xf32>
    %187 = arith.divf %185, %186 : vector<16x1xf32>
    %188 = vector.broadcast %180 : vector<16x1xf32> to vector<16x32xf32>
    %189 = arith.subf %172, %188 : vector<16x32xf32>
    %cst_115 = arith.constant 9.99999974E-6 : f32
    %190 = vector.broadcast %cst_115 : f32 to vector<16x1xf32>
    %191 = arith.addf %187, %190 : vector<16x1xf32>
    %192 = math.rsqrt %191 : vector<16x1xf32>
    %193 = vector.broadcast %192 : vector<16x1xf32> to vector<16x32xf32>
    %194 = arith.mulf %189, %193 : vector<16x32xf32>
    %195 = vector.broadcast %174 : vector<1x32xf32> to vector<16x32xf32>
    %196 = arith.mulf %194, %195 : vector<16x32xf32>
    %197 = vector.broadcast %176 : vector<1x32xf32> to vector<16x32xf32>
    %198 = arith.addf %196, %197 : vector<16x32xf32>
    %c1_116 = arith.constant 1 : index
    %c0_117 = arith.constant 0 : index
    %c0_118 = arith.constant 0 : index
    %199 = vector.load %arg12[%c1_116, %c0_117, %c0_118] : memref<2x32x64xf32, #tpu.memory_space<vmem>>, vector<1x32x64xf32>
    %200 = vector.shape_cast %199 : vector<1x32x64xf32> to vector<32x64xf32>
    %cst_119 = arith.constant dense<0.000000e+00> : vector<16x64xf32>
    %201 = tpu.matmul %198, %200, %cst_119 {dimension_numbers = #tpu.dot_dimension_numbers<[1], [0], [0], [1], [0, 0, 1, 1], [], []>} : vector<16x32xf32>, vector<32x64xf32>, vector<16x64xf32> -> vector<16x64xf32>
    %c1_120 = arith.constant 1 : index
    %c0_121 = arith.constant 0 : index
    %c0_122 = arith.constant 0 : index
    %202 = vector.load %arg13[%c1_120, %c0_121, %c0_122] : memref<2x1x64xf32, #tpu.memory_space<vmem>>, vector<1x1x64xf32>
    %203 = vector.shape_cast %202 : vector<1x1x64xf32> to vector<1x64xf32>
    %204 = vector.broadcast %203 : vector<1x64xf32> to vector<16x64xf32>
    %205 = arith.addf %201, %204 : vector<16x64xf32>
    %cst_123 = arith.constant 5.000000e-01 : f32
    %206 = vector.broadcast %cst_123 : f32 to vector<16x64xf32>
    %207 = arith.mulf %206, %205 : vector<16x64xf32>
    %cst_124 = arith.constant 0.707106769 : f32
    %208 = vector.broadcast %cst_124 : f32 to vector<16x64xf32>
    %209 = arith.mulf %205, %208 : vector<16x64xf32>
    %210 = math.erf %209 : vector<16x64xf32>
    %cst_125 = arith.constant 1.000000e+00 : f32
    %211 = vector.broadcast %cst_125 : f32 to vector<16x64xf32>
    %212 = arith.addf %211, %210 : vector<16x64xf32>
    %213 = arith.mulf %207, %212 : vector<16x64xf32>
    %c1_126 = arith.constant 1 : index
    %c0_127 = arith.constant 0 : index
    %c0_128 = arith.constant 0 : index
    %214 = vector.load %arg14[%c1_126, %c0_127, %c0_128] : memref<2x64x32xf32, #tpu.memory_space<vmem>>, vector<1x64x32xf32>
    %215 = vector.shape_cast %214 : vector<1x64x32xf32> to vector<64x32xf32>
    %cst_129 = arith.constant dense<0.000000e+00> : vector<16x32xf32>
    %216 = tpu.matmul %213, %215, %cst_129 {dimension_numbers = #tpu.dot_dimension_numbers<[1], [0], [0], [1], [0, 0, 1, 1], [], []>} : vector<16x64xf32>, vector<64x32xf32>, vector<16x32xf32> -> vector<16x32xf32>
    %c1_130 = arith.constant 1 : index
    %c0_131 = arith.constant 0 : index
    %c0_132 = arith.constant 0 : index
    %217 = vector.load %arg15[%c1_130, %c0_131, %c0_132] : memref<2x1x32xf32, #tpu.memory_space<vmem>>, vector<1x1x32xf32>
    %218 = vector.shape_cast %217 : vector<1x1x32xf32> to vector<1x32xf32>
    %219 = vector.broadcast %218 : vector<1x32xf32> to vector<16x32xf32>
    %220 = arith.addf %216, %219 : vector<16x32xf32>
    %221 = arith.addf %198, %220 : vector<16x32xf32>
    %c1_133 = arith.constant 1 : index
    %c0_134 = arith.constant 0 : index
    %c0_135 = arith.constant 0 : index
    %222 = vector.load %arg16[%c1_133, %c0_134, %c0_135] : memref<2x1x32xf32, #tpu.memory_space<vmem>>, vector<1x1x32xf32>
    %223 = vector.shape_cast %222 : vector<1x1x32xf32> to vector<1x32xf32>
    %c1_136 = arith.constant 1 : index
    %c0_137 = arith.constant 0 : index
    %c0_138 = arith.constant 0 : index
    %224 = vector.load %arg17[%c1_136, %c0_137, %c0_138] : memref<2x1x32xf32, #tpu.memory_space<vmem>>, vector<1x1x32xf32>
    %225 = vector.shape_cast %224 : vector<1x1x32xf32> to vector<1x32xf32>
    %cst_139 = arith.constant dense<0.000000e+00> : vector<16xf32>
    %226 = vector.multi_reduction <add>, %221, %cst_139 [1] : vector<16x32xf32> to vector<16xf32>
    %227 = vector.shape_cast %226 : vector<16xf32> to vector<16x1xf32>
    %cst_140 = arith.constant 3.200000e+01 : f32
    %228 = vector.broadcast %cst_140 : f32 to vector<16x1xf32>
    %229 = arith.divf %227, %228 : vector<16x1xf32>
    %230 = vector.broadcast %229 : vector<16x1xf32> to vector<16x32xf32>
    %231 = arith.subf %221, %230 : vector<16x32xf32>
    %232 = arith.mulf %231, %231 : vector<16x32xf32>
    %cst_141 = arith.constant dense<0.000000e+00> : vector<16xf32>
    %233 = vector.multi_reduction <add>, %232, %cst_141 [1] : vector<16x32xf32> to vector<16xf32>
    %234 = vector.shape_cast %233 : vector<16xf32> to vector<16x1xf32>
    %cst_142 = arith.constant 3.200000e+01 : f32
    %235 = vector.broadcast %cst_142 : f32 to vector<16x1xf32>
    %236 = arith.divf %234, %235 : vector<16x1xf32>
    %237 = vector.broadcast %229 : vector<16x1xf32> to vector<16x32xf32>
    %238 = arith.subf %221, %237 : vector<16x32xf32>
    %cst_143 = arith.constant 9.99999974E-6 : f32
    %239 = vector.broadcast %cst_143 : f32 to vector<16x1xf32>
    %240 = arith.addf %236, %239 : vector<16x1xf32>
    %241 = math.rsqrt %240 : vector<16x1xf32>
    %242 = vector.broadcast %241 : vector<16x1xf32> to vector<16x32xf32>
    %243 = arith.mulf %238, %242 : vector<16x32xf32>
    %244 = vector.broadcast %223 : vector<1x32xf32> to vector<16x32xf32>
    %245 = arith.mulf %243, %244 : vector<16x32xf32>
    %246 = vector.broadcast %225 : vector<1x32xf32> to vector<16x32xf32>
    %247 = arith.addf %245, %246 : vector<16x32xf32>
    %c0_144 = arith.constant 0 : index
    %c0_145 = arith.constant 0 : index
    %248 = vector.load %arg21[%c0_144, %c0_145] : memref<8x32xf32, #tpu.memory_space<vmem>>, vector<8x32xf32>
    %249 = vector.shape_cast %247 : vector<16x32xf32> to vector<2x8x32xf32>
    %cst_146 = arith.constant dense<0.000000e+00> : vector<8x32xf32>
    %250 = vector.multi_reduction <add>, %249, %cst_146 [0] : vector<2x8x32xf32> to vector<8x32xf32>
    %251 = arith.addf %248, %250 : vector<8x32xf32>
    %c0_147 = arith.constant 0 : index
    %c0_148 = arith.constant 0 : index
    %252 = vector.load %arg21[%c0_147, %c0_148] : memref<8x32xf32, #tpu.memory_space<vmem>>, vector<8x32xf32>
    tpu.vector_store %arg21[%c0_147, %c0_148], %251 {strides = array<i32>} : memref<8x32xf32, #tpu.memory_space<vmem>>, vector<8x32xf32>,
    %c0_i32_149 = arith.constant 0 : i32
    %253 = arith.cmpi eq, %arg0, %c0_i32_149 : i32
    %254 = arith.extui %253 : i1 to i32
    %c0_i32_150 = arith.constant 0 : i32
    %255 = arith.cmpi ne, %254, %c0_i32_150 : i32
    scf.if %255 {
      %c0_151 = arith.constant 0 : index
      %c0_152 = arith.constant 0 : index
      %256 = vector.load %arg21[%c0_151, %c0_152] : memref<8x32xf32, #tpu.memory_space<vmem>>, vector<8x32xf32>
      %cst_153 = arith.constant 5.000000e-01 : f32
      %257 = vector.broadcast %cst_153 : f32 to vector<8x32xf32>
      %258 = arith.mulf %256, %257 : vector<8x32xf32>
      %c0_154 = arith.constant 0 : index
      %c0_155 = arith.constant 0 : index
      %259 = vector.load %arg18[%c0_154, %c0_155] : memref<32x8xf32, #tpu.memory_space<vmem>>, vector<32x8xf32>
      %cst_156 = arith.constant dense<0.000000e+00> : vector<8x8xf32>
      %260 = tpu.matmul %258, %259, %cst_156 {dimension_numbers = #tpu.dot_dimension_numbers<[1], [0], [0], [1], [0, 0, 1, 1], [], []>} : vector<8x32xf32>, vector<32x8xf32>, vector<8x8xf32> -> vector<8x8xf32>
      %c0_157 = arith.constant 0 : index
      %c0_158 = arith.constant 0 : index
      %261 = vector.load %arg19[%c0_157, %c0_158] : memref<1x8xf32, #tpu.memory_space<vmem>>, vector<1x8xf32>
      %262 = vector.broadcast %261 : vector<1x8xf32> to vector<8x8xf32>
      %263 = arith.addf %260, %262 : vector<8x8xf32>
      %c0_159 = arith.constant 0 : index
      %c0_160 = arith.constant 0 : index
      %264 = vector.load %arg20[%c0_159, %c0_160] : memref<8x8xf32, #tpu.memory_space<vmem>>, vector<8x8xf32>
      tpu.vector_store %arg20[%c0_159, %c0_160], %263 {strides = array<i32>} : memref<8x8xf32, #tpu.memory_space<vmem>>, vector<8x8xf32>,
    } else {
    }
    return
  }
  func.func @transform_0(%arg0: i32) -> (i32, i32) {
    %c0_i32 = arith.constant 0 : i32
    %c0_i32_0 = arith.constant 0 : i32
    return %arg0, %c0_i32 : i32, i32
  }
  func.func @transform_1(%arg0: i32) -> (i32, i32, i32) {
    %c0_i32 = arith.constant 0 : i32
    %c0_i32_0 = arith.constant 0 : i32
    %c0_i32_1 = arith.constant 0 : i32
    %c0_i32_2 = arith.constant 0 : i32
    return %c0_i32, %c0_i32_0, %c0_i32_1 : i32, i32, i32
  }
  func.func @transform_2(%arg0: i32) -> (i32, i32, i32) {
    %c0_i32 = arith.constant 0 : i32
    %c0_i32_0 = arith.constant 0 : i32
    %c0_i32_1 = arith.constant 0 : i32
    %c0_i32_2 = arith.constant 0 : i32
    return %c0_i32, %c0_i32_0, %c0_i32_1 : i32, i32, i32
  }
  func.func @transform_3(%arg0: i32) -> (i32, i32, i32) {
    %c0_i32 = arith.constant 0 : i32
    %c0_i32_0 = arith.constant 0 : i32
    %c0_i32_1 = arith.constant 0 : i32
    %c0_i32_2 = arith.constant 0 : i32
    return %c0_i32, %c0_i32_0, %c0_i32_1 : i32, i32, i32
  }
  func.func @transform_4(%arg0: i32) -> (i32, i32, i32) {
    %c0_i32 = arith.constant 0 : i32
    %c0_i32_0 = arith.constant 0 : i32
    %c0_i32_1 = arith.constant 0 : i32
    %c0_i32_2 = arith.constant 0 : i32
    return %c0_i32, %c0_i32_0, %c0_i32_1 : i32, i32, i32
  }
  func.func @transform_5(%arg0: i32) -> (i32, i32, i32) {
    %c0_i32 = arith.constant 0 : i32
    %c0_i32_0 = arith.constant 0 : i32
    %c0_i32_1 = arith.constant 0 : i32
    %c0_i32_2 = arith.constant 0 : i32
    return %c0_i32, %c0_i32_0, %c0_i32_1 : i32, i32, i32
  }
  func.func @transform_6(%arg0: i32) -> (i32, i32, i32) {
    %c0_i32 = arith.constant 0 : i32
    %c0_i32_0 = arith.constant 0 : i32
    %c0_i32_1 = arith.constant 0 : i32
    %c0_i32_2 = arith.constant 0 : i32
    return %c0_i32, %c0_i32_0, %c0_i32_1 : i32, i32, i32
  }
  func.func @transform_7(%arg0: i32) -> (i32, i32, i32) {
    %c0_i32 = arith.constant 0 : i32
    %c0_i32_0 = arith.constant 0 : i32
    %c0_i32_1 = arith.constant 0 : i32
    %c0_i32_2 = arith.constant 0 : i32
    return %c0_i32, %c0_i32_0, %c0_i32_1 : i32, i32, i32
  }
  func.func @transform_8(%arg0: i32) -> (i32, i32, i32) {
    %c0_i32 = arith.constant 0 : i32
    %c0_i32_0 = arith.constant 0 : i32
    %c0_i32_1 = arith.constant 0 : i32
    %c0_i32_2 = arith.constant 0 : i32
    return %c0_i32, %c0_i32_0, %c0_i32_1 : i32, i32, i32
  }
  func.func @transform_9(%arg0: i32) -> (i32, i32, i32) {
    %c0_i32 = arith.constant 0 : i32
    %c0_i32_0 = arith.constant 0 : i32
    %c0_i32_1 = arith.constant 0 : i32
    %c0_i32_2 = arith.constant 0 : i32
    return %c0_i32, %c0_i32_0, %c0_i32_1 : i32, i32, i32
  }
  func.func @transform_10(%arg0: i32) -> (i32, i32, i32) {
    %c0_i32 = arith.constant 0 : i32
    %c0_i32_0 = arith.constant 0 : i32
    %c0_i32_1 = arith.constant 0 : i32
    %c0_i32_2 = arith.constant 0 : i32
    return %c0_i32, %c0_i32_0, %c0_i32_1 : i32, i32, i32
  }
  func.func @transform_11(%arg0: i32) -> (i32, i32, i32) {
    %c0_i32 = arith.constant 0 : i32
    %c0_i32_0 = arith.constant 0 : i32
    %c0_i32_1 = arith.constant 0 : i32
    %c0_i32_2 = arith.constant 0 : i32
    return %c0_i32, %c0_i32_0, %c0_i32_1 : i32, i32, i32
  }
  func.func @transform_12(%arg0: i32) -> (i32, i32, i32) {
    %c0_i32 = arith.constant 0 : i32
    %c0_i32_0 = arith.constant 0 : i32
    %c0_i32_1 = arith.constant 0 : i32
    %c0_i32_2 = arith.constant 0 : i32
    return %c0_i32, %c0_i32_0, %c0_i32_1 : i32, i32, i32
  }
  func.func @transform_13(%arg0: i32) -> (i32, i32, i32) {
    %c0_i32 = arith.constant 0 : i32
    %c0_i32_0 = arith.constant 0 : i32
    %c0_i32_1 = arith.constant 0 : i32
    %c0_i32_2 = arith.constant 0 : i32
    return %c0_i32, %c0_i32_0, %c0_i32_1 : i32, i32, i32
  }
  func.func @transform_14(%arg0: i32) -> (i32, i32, i32) {
    %c0_i32 = arith.constant 0 : i32
    %c0_i32_0 = arith.constant 0 : i32
    %c0_i32_1 = arith.constant 0 : i32
    %c0_i32_2 = arith.constant 0 : i32
    return %c0_i32, %c0_i32_0, %c0_i32_1 : i32, i32, i32
  }
  func.func @transform_15(%arg0: i32) -> (i32, i32, i32) {
    %c0_i32 = arith.constant 0 : i32
    %c0_i32_0 = arith.constant 0 : i32
    %c0_i32_1 = arith.constant 0 : i32
    %c0_i32_2 = arith.constant 0 : i32
    return %c0_i32, %c0_i32_0, %c0_i32_1 : i32, i32, i32
  }
  func.func @transform_16(%arg0: i32) -> (i32, i32, i32) {
    %c0_i32 = arith.constant 0 : i32
    %c0_i32_0 = arith.constant 0 : i32
    %c0_i32_1 = arith.constant 0 : i32
    %c0_i32_2 = arith.constant 0 : i32
    return %c0_i32, %c0_i32_0, %c0_i32_1 : i32, i32, i32
  }
  func.func @transform_17(%arg0: i32) -> (i32, i32) {
    %c0_i32 = arith.constant 0 : i32
    %c0_i32_0 = arith.constant 0 : i32
    %c0_i32_1 = arith.constant 0 : i32
    return %c0_i32, %c0_i32_0 : i32, i32
  }
  func.func @transform_18(%arg0: i32) -> (i32, i32) {
    %c0_i32 = arith.constant 0 : i32
    %c0_i32_0 = arith.constant 0 : i32
    %c0_i32_1 = arith.constant 0 : i32
    return %c0_i32, %c0_i32_0 : i32, i32
  }
  func.func @transform_19(%arg0: i32) -> (i32, i32) {
    %c0_i32 = arith.constant 0 : i32
    %c0_i32_0 = arith.constant 0 : i32
    %c0_i32_1 = arith.constant 0 : i32
    return %c0_i32, %c0_i32_0 : i32, i32
  }
}

</mosaic_0001>

<bundles_post_ra>
// kernel: tpu_custom_call.1
= control target key start
LH: loop header
LB: loop body
LE: loop exit
PB: predicated region body
PF: predicated region fallthrough
CT: control target
= control target key end

     0   :  { %s3106_s0 = inlined_call_operand.vmem [shape: f32[16,32], index: 0, kind: input, shape index: {}]   ;;  %s3107_s1 = inlined_call_operand.vmem [shape: f32[2,32,32], index: 1, kind: input, shape index: {}]   ;;  %s3108_s2 = inlined_call_operand.vmem [shape: f32[2,1,32], index: 2, kind: input, shape index: {}]   ;;  %s3109_s3 = inlined_call_operand.vmem [shape: f32[2,32,32], index: 3, kind: input, shape index: {}]   ;;  %s3110_s4 = inlined_call_operand.vmem [shape: f32[2,1,32], index: 4, kind: input, shape index: {}]   ;;  %s3111_s5 = inlined_call_operand.vmem [shape: f32[2,32,32], index: 5, kind: input, shape index: {}]   ;;  %s3112_s6 = inlined_call_operand.vmem [shape: f32[2,1,32], index: 6, kind: input, shape index: {}]   ;;  %s3113_s7 = inlined_call_operand.hbm [shape: f32[2,32,32], index: 7, kind: input, shape index: {}]   ;;  %s3114_s8 = inlined_call_operand.vmem [shape: f32[2,1,32], index: 8, kind: input, shape index: {}]   ;;  %s3115_s9 = inlined_call_operand.vmem [shape: f32[2,1,32], index: 9, kind: input, shape index: {}]   ;;  %s3116_s10 = inlined_call_operand.vmem [shape: f32[2,1,32], index: 10, kind: input, shape index: {}]   ;;  %s3117_s11 = inlined_call_operand.hbm [shape: f32[2,32,64], index: 11, kind: input, shape index: {}]   ;;  %s3118_s12 = inlined_call_operand.vmem [shape: f32[2,1,64], index: 12, kind: input, shape index: {}]   ;;  %s3119_s13 = inlined_call_operand.vmem [shape: f32[2,64,32], index: 13, kind: input, shape index: {}]   ;;  %s3120_s14 = inlined_call_operand.vmem [shape: f32[2,1,32], index: 14, kind: input, shape index: {}]   ;;  %s3121_s15 = inlined_call_operand.vmem [shape: f32[2,1,32], index: 15, kind: input, shape index: {}]   ;;  %s3122_s16 = inlined_call_operand.vmem [shape: f32[2,1,32], index: 16, kind: input, shape index: {}]   ;;  %s3123_s17 = inlined_call_operand.vmem [shape: f32[32,8], index: 17, kind: input, shape index: {}]   ;;  %s3124_s18 = inlined_call_operand.vmem [shape: f32[1,8], index: 18, kind: input, shape index: {}]   ;;  %s3125_s19 = inlined_call_operand.hbm [shape: f32[8,8], index: 19, kind: output, shape index: {}]  }
   0x1   :  { %3130 = sst [smem:[#allocation12_spill]] %s3106_s0 }
   0x2   :  { %3131 = sst [smem:[#allocation13_spill]] %s3107_s1 }
   0x3   :  { %3132 = sst [smem:[#allocation14_spill]] %s3108_s2 }
   0x4   :  { %3133 = sst [smem:[#allocation15_spill]] %s3109_s3 }
   0x5   :  { %24 = vsyncpa [#allocation4], 0 }
   0x6   :  { %25 = vsyncpa [#allocation7], 0 }
   0x7   :  { %26 = vsyncpa [#allocation5], 0  ;;  %s2668_s0 = smov [#allocation3]  }
   0x8   :  { %s46_s30 = sshll.u32 %s2668_s0, 4  ;;  %s47_s30 = int_to_ptr.vmem [resolvable:$true] %s46_s30 }
   0x9   :  { %s2610_s20 = scalar_lea.vmem %s47_s30, 1024  ;;  %p2615_p1 = scmp.lt.s32.totalorder %s47_s30, %s47_s30 }
   0xa   :  { %p2611_p0 = scmp.ne.s32.totalorder %s47_s30, %s2610_s20  ;;  %p2616_p2 = scmp.lt.s32.totalorder %s2610_s20, %s2610_s20 }
   0xc   :  { %p2617_p3 = por %p2616_p2, %p2615_p1 }
   0xe   :  { %p2618_p4 = pnand %p2617_p3, %p2611_p0 }
  0x10   :  { %2621 = shalt.err (!%p2618_p4)
}
  0x11   :  { %s2669_s21 = smov 128   ;;  %s2670_s1 = smov 8  }
  0x12   :  { %52 = dma.hbm_to_vmem [thread:$0]  %s3113_s7, 1024, %s47_s30, [#allocation4], %s2669_s21, %s2669_s21, %s2670_s1  }
  0x13   :  { %s2671_s23 = smov [#allocation6]  }
  0x14   :  { %s64_s24 = sshll.u32 %s2671_s23, 4  ;;  %s65_s24 = int_to_ptr.vmem [resolvable:$true] %s64_s24 }
  0x15   :  { %s2630_s25 = scalar_lea.vmem %s65_s24, 1024  ;;  %p2635_p6 = scmp.lt.s32.totalorder %s65_s24, %s65_s24 }
  0x16   :  { %p2631_p5 = scmp.ne.s32.totalorder %s65_s24, %s2630_s25  ;;  %p2636_p7 = scmp.lt.s32.totalorder %s2630_s25, %s2630_s25 }
  0x18   :  { %p2637_p8 = por %p2636_p7, %p2635_p6 }
  0x1a   :  { %p2638_p9 = pnand %p2637_p8, %p2631_p5 }
  0x1c   :  { %2641 = shalt.err (!%p2638_p9)
}
  0x1d   :  { %70 = dma.hbm_to_vmem [thread:$0]  %s3117_s11, 1024, %s65_s24, [#allocation7], %s2669_s21, %s2669_s21, %s2670_s1  }
  0x1e   :  { %2662 = dma.done.wait [#allocation4], 1024  }
  0x1f   :  { %2663 = vsyncadd [#allocation4], 4294966272 }
  0x20   :  { %2664 = dma.done.wait [#allocation7], 1024  }
  0x21   :  { %2665 = vsyncadd [#allocation7], 4294966272  ;;  %s3134_s28 = sld [smem:[#allocation13_spill]]  ;;  %vm95_vm0 = vcmask 261120   ;;  %v2672_v10 = vmov 0.0   ;;  %vm2673_vm1 = vmmov 0  }
  0x22   :  { %s3135_s30 = sld [smem:[#allocation15_spill]]  ;;  %96 = vst.msk [vmem:[#allocation2] sm:$0xff] %vm95_vm0, %v2672_v10  ;;  %v2170_v14 = vld [vmem:[%s3110_s4] ss:$0 sm:$0xff]  ;;  %v281_v23 = vld [vmem:[%s3111_s5 + $0x18] sm:$0xff]  ;;  %v280_v24 = vld [vmem:[%s3111_s5 + $0x10] sm:$0xff] }
  0x23   :  { %s3136_s0 = sld [smem:[#allocation12_spill]]  ;;  %v279_v25 = vld [vmem:[%s3111_s5 + $0x8] sm:$0xff]  ;;  %v278_v26 = vld [vmem:[%s3111_s5] sm:$0xff]  ;;  %vm518_vm2 = vcmask 64512   ;;  %v689_v49 = vld [vmem:[#allocation3 + $0x10] sm:$0xff]  ;;  %vm943_vm3 = vcmask 523264  }
  0x24   :  { %s3137_s21 = sld [smem:[#allocation14_spill]]  ;;  %v2173_v44 = vld [vmem:[%s3112_s6] ss:$0 sm:$0xff]  ;;  %v688_v56 = vld [vmem:[#allocation3 + $0x8] sm:$0xff]  ;;  %v687_v57 = vld [vmem:[#allocation3] sm:$0xff]  ;;  %s2674_s24 = smov [#allocation8]  }
  0x25   :  { %v690_v48 = vld [vmem:[#allocation3 + $0x18] sm:$0xff]  ;;  %s2157_s25 = sshll.u32 %s2674_s24, 4  ;;  %s2158_s25 = int_to_ptr.vmem [resolvable:$true] %s2157_s25 }
  0x26   :  { %v2182_v62 = vld [vmem:[%s3114_s8] ss:$0 sm:$0xff]  ;;  %s2642_s3 = scalar_lea.vmem %s2158_s25, 128  ;;  %p2647_p11 = scmp.lt.s32.totalorder %s2158_s25, %s2158_s25 }
  0x27   :  { %v102_v0 = vld [vmem:[%s3134_s28 + $0x18] sm:$0xff]  ;;  %v101_v2 = vld [vmem:[%s3134_s28 + $0x10] sm:$0xff]  ;;  %v100_v4 = vld [vmem:[%s3134_s28 + $0x8] sm:$0xff]  ;;  %p2643_p10 = scmp.ne.s32.totalorder %s2158_s25, %s2642_s3  ;;  %p2648_p12 = scmp.lt.s32.totalorder %s2642_s3, %s2642_s3 }
  0x28   :  { %v195_v1 = vld [vmem:[%s3135_s30 + $0x18] sm:$0xff]  ;;  %2356 = vmatprep.subr.mxu0 %v102_v0  ;;  %v194_v3 = vld [vmem:[%s3135_s30 + $0x10] sm:$0xff]  ;;  %v193_v5 = vld [vmem:[%s3135_s30 + $0x8] sm:$0xff] }
  0x29   :  { %2367 = vmatprep.subr.mxu1 %v195_v1  ;;  %2357 = vmatpush3.msra.mxu0 %v102_v0  ;;  %v99_v6 = vld [vmem:[%s3134_s28] sm:$0xff]  ;;  %v2813_v9 = vld [vmem:[%s3136_s0 + $0x8] sm:$0xff]  ;;  %p2649_p13 = por %p2648_p12, %p2647_p11 }
  0x2a   :  { %2368 = vmatpush3.msra.mxu1 %v195_v1  ;;  %2358 = vmatprep.subr.mxu0 %v101_v2  ;;  %v192_v7 = vld [vmem:[%s3135_s30] sm:$0xff] }
  0x2b   :  { %2369 = vmatprep.subr.mxu1 %v194_v3  ;;  %2359 = vmatpush3.msra.mxu0 %v101_v2  ;;  %v2808_v8 = vld [vmem:[%s3136_s0] sm:$0xff]  ;;  %p2650_p0 = pnand %p2649_p13, %p2643_p10 }
  0x2c   :  { %2370 = vmatpush3.msra.mxu1 %v194_v3  ;;  %2360 = vmatprep.subr.mxu0 %v100_v4  ;;  %v2167_v12 = vld [vmem:[%s3137_s21] ss:$0 sm:$0xff] }
  0x2d   :  { %2371 = vmatprep.subr.mxu1 %v193_v5  ;;  %2361 = vmatpush3.msra.mxu0 %v100_v4 }
  0x2e   :  { %2372 = vmatpush3.msra.mxu1 %v193_v5  ;;  %2362 = vmatprep.subr.mxu0 %v99_v6 }
  0x2f   :  { %2373 = vmatprep.subr.mxu1 %v192_v7  ;;  %2363 = vmatpush3.msra.mxu0 %v99_v6 }
  0x30   :  { %2364 = vmatprep.mubr.msk.f32.mxu0 %vm95_vm0, %v2808_v8  ;;  %2374 = vmatpush3.msra.mxu1 %v192_v7 }
  0x31   :  { %2375 = vmatprep.mubr.msk.f32.mxu1 %vm95_vm0, %v2808_v8  ;;  %2365 = vmatmul.mubr.msk.f32.vlgmr.msra.gmra.mxu0 %vm95_vm0, %v2813_v9 }
  0x32   :  { %2376 = vmatmul.mubr.msk.f32.vlgmr.msra.gmra.mxu1 %vm95_vm0, %v2813_v9  ;;  %2386 = vmatprep.mubr.msk.f32.mxu0 %vm95_vm0, %v2808_v8 }
  0x33   :  { %2389 = vmatprep.subr.mxu1 %v2672_v10  ;;  %2391 = vmatprep.mubr.msk.f32.mxu1 %vm2673_vm1, %v2672_v10 }
  0x34   :  { %2378 = vmatprep.subr.mxu0 %v281_v23 }
  0x35   :  { %2379 = vmatpush3.msra.mxu0 %v281_v23 }
  0x36   :  { %2380 = vmatprep.subr.mxu0 %v280_v24 }
  0x37   :  { %2381 = vmatpush3.msra.mxu0 %v280_v24 }
  0x38   :  { %2382 = vmatprep.subr.mxu0 %v279_v25 }
  0x39   :  { %2383 = vmatpush3.msra.mxu0 %v279_v25 }
  0x3a   :  { %2384 = vmatprep.subr.mxu0 %v278_v26 }
  0x3b   :  { %2385 = vmatpush3.msra.mxu0 %v278_v26 }
  0x3c   :  { %2387 = vmatmul.mubr.msk.f32.vlgmr.msra.gmra.mxu0 %vm95_vm0, %v2813_v9  ;;  %2409 = vmatprep.subr.mxu0 %v690_v48 }
  0x3d   :  { %2410 = vmatpush3.msra.mxu0 %v690_v48 }
  0x3e   :  { %2411 = vmatprep.subr.mxu0 %v689_v49 }
  0x3f   :  { %2412 = vmatpush3.msra.mxu0 %v689_v49 }
  0x40   :  { %2413 = vmatprep.subr.mxu0 %v688_v56 }
  0x41   :  { %2414 = vmatpush3.msra.mxu0 %v688_v56 }
  0x42   :  { %2415 = vmatprep.subr.mxu0 %v687_v57 }
  0x43   :  { %2416 = vmatpush3.msra.mxu0 %v687_v57 }
  0xf1   :  { %v2366_v11 = vpop.f32.mrf.mxu0 }
  0xf2   :  { %v2377_v13 = vpop.f32.mrf.mxu1  ;;  %v189_v20 = vadd.f32 %v2366_v11, %v2167_v12 }
  0xf3   :  { %v183_v15 = vpop.f32.mrf.mxu0  ;;  %v275_v21 = vadd.f32 %v2377_v13, %v2170_v14 }
  0xf4   :  { %v269_v16 = vpop.f32.mrf.mxu1  ;;  %v184_v17 = vadd.f32 %v2167_v12, %v183_v15  ;;  %v365_v22 = vmul.f32 0.17677669, %v189_v20  ;;  %v827_v20 = vld [vmem:[#allocation6 + $0x8] sm:$0xff] }
  0xf5   :  { %v270_v18 = vadd.f32 %v2170_v14, %v269_v16 }
  0xf6   :  { %v364_v19 = vmul.f32 0.17677669, %v184_v17 }
  0xf7   :  { %2390 = vmatpush3.xpose.msk.msra.mxu1 %vm95_vm0, %v270_v18 }
  0xf8   :  { %2394 = vmatprep.subr.mxu1 %v2672_v10 }
  0xfa   :  { %2392 = vmatmul.mubr.msk.f32.vlgmr.msra.gmra.mxu1 %vm95_vm0, %v364_v19  ;;  %v829_v19 = vld [vmem:[#allocation6 + $0x18] sm:$0xff] }
  0xfb   :  { %2395 = vmatpush3.xpose.msk.msra.mxu1 %vm95_vm0, %v275_v21  ;;  %2396 = vmatprep.mubr.msk.f32.mxu1 %vm2673_vm1, %v2672_v10  ;;  %v826_v21 = vld [vmem:[#allocation6] sm:$0xff] }
  0xfc   :  { %2399 = vmatprep.subr.mxu1 %v2672_v10  ;;  %v2388_v43 = vpop.f32.mrf.mxu0 }
  0xfd   :  { %v361_v45 = vadd.f32 %v2388_v43, %v2173_v44  ;;  %v930_v43 = vld [vmem:[%s3119_s13 + $0x10] sm:$0xff] }
  0xfe   :  { %2397 = vmatmul.mubr.msk.f32.vlgmr.msra.gmra.mxu1 %vm95_vm0, %v365_v22  ;;  %v355_v46 = vpop.f32.mrf.mxu0 }
  0xff   :  { %2401 = vmatprep.mubr.msk.f32.mxu1 %vm2673_vm1, %v2672_v10  ;;  %v356_v47 = vadd.f32 %v2173_v44, %v355_v46  ;;  %v929_v44 = vld [vmem:[%s3119_s13 + $0x8] sm:$0xff]  ;;  %v2187_v46 = vld [vmem:[%s3118_s12] ss:$0 sm:$0xff] }
 0x101   :  { %2400 = vmatpush3.msra.mxu1 %v356_v47 }
 0x102   :  { %2404 = vmatprep.subr.mxu1 %v2672_v10 }
 0x1ba   :  { %v438_v27 = vpop.f32.mrf.mxu1 }
 0x1bb   :  { %v519_v28 = vsel %vm518_vm2, %v438_v27, -inf }
 0x1bc   :  { %520 = vmax.xlane.f32.xlu0 %v519_v28  ;;  %v2393_v29 = vpop.f32.mrf.mxu1 }
 0x1bd   :  { %v2185_v29 = vld [vmem:[%s3115_s9] ss:$0 sm:$0xff] }
 0x1be   :  { %v514_v30 = vpop.f32.mrf.mxu1 }
 0x1bf   :  { %v522_v31 = vsel %vm518_vm2, %v514_v30, -inf }
 0x1c0   :  { %523 = vmax.xlane.f32.xlu0 %v522_v31  ;;  %v2398_v32 = vpop.f32.mrf.mxu1 }
 0x245   :  { %v521_v33 = vpop.xlane.xlu0 %520 }
 0x246   :  { %v525_v34 = vsub.f32 %v438_v27, %v521_v33 }
 0x248   :  { %v527_v35 = vmul.f32 1.442695, %v525_v34  ;;  %v2186_v34 = vld [vmem:[%s3116_s10] ss:$0 sm:$0xff] }
 0x249   :  { %v524_v36 = vpop.xlane.xlu0 %523 }
 0x24a   :  { %2562 = vpow2.f32 %v527_v35  ;;  %v526_v37 = vsub.f32 %v514_v30, %v524_v36 }
 0x24c   :  { %v529_v38 = vmul.f32 1.442695, %v526_v37 }
 0x24e   :  { %2564 = vpow2.f32 %v529_v38  ;;  %v935_v38 = vld [vmem:[%s3119_s13 + $0x38] sm:$0xff] }
 0x24f   :  { %2431 = vmatprep.subr.mxu0 %v935_v38 }
 0x257   :  { %v2563_v39 = vpop.eup %2562 }
 0x258   :  { %v531_v40 = vsel %vm518_vm2, %v2563_v39, 0.0 }
 0x259   :  { %532 = vadd.xlane.f32.xlu1 %v531_v40  ;;  %v933_v40 = vld [vmem:[%s3119_s13 + $0x28] sm:$0xff] }
 0x25b   :  { %v2565_v41 = vpop.eup %2564 }
 0x25c   :  { %v534_v42 = vsel %vm518_vm2, %v2565_v41, 0.0 }
 0x25d   :  { %535 = vadd.xlane.f32.xlu1 %v534_v42  ;;  %v931_v42 = vld [vmem:[%s3119_s13 + $0x18] sm:$0xff] }
 0x2e2   :  { %v533_v50 = vpop.xlane.xlu1 %532 }
 0x2e3   :  { %2566 = vrcp.f32 %v533_v50 }
 0x2e6   :  { %v536_v51 = vpop.xlane.xlu1 %535 }
 0x2e7   :  { %2568 = vrcp.f32 %v536_v51 }
 0x2f0   :  { %v2567_v52 = vpop.eup %2566 }
 0x2f1   :  { %v539_v53 = vmul.f32 %v2567_v52, %v2563_v39  ;;  %v934_v39 = vld [vmem:[%s3119_s13 + $0x30] sm:$0xff] }
 0x2f3   :  { %2402 = vmatmul.mubr.msk.f32.vlgmr.msra.gmra.mxu1 %vm518_vm2, %v539_v53 }
 0x2f4   :  { %v2569_v54 = vpop.eup %2568  ;;  %2405 = vmatpush3.msra.mxu1 %v361_v45  ;;  %2406 = vmatprep.mubr.msk.f32.mxu1 %vm2673_vm1, %v2672_v10  ;;  %v928_v45 = vld [vmem:[%s3119_s13] sm:$0xff] }
 0x2f5   :  { %v540_v55 = vmul.f32 %v2569_v54, %v2565_v41  ;;  %2420 = vmatprep.subr.mxu1 %v829_v19  ;;  %v932_v41 = vld [vmem:[%s3119_s13 + $0x20] sm:$0xff] }
 0x2f7   :  { %2407 = vmatmul.mubr.msk.f32.vlgmr.msra.gmra.mxu1 %vm518_vm2, %v540_v55 }
 0x2f8   :  { %2421 = vmatpush3.msra.mxu1 %v829_v19  ;;  %v2214_v19 = vld [vmem:[%s3111_s5 + $0x38] sm:$0xff] }
 0x3b3   :  { %v610_v58 = vpop.f32.mrf.mxu1 }
 0x3b4   :  { %2417 = vmatprep.mubr.msk.f32.mxu0 %vm95_vm0, %v610_v58 }
 0x3b5   :  { %v2403_v59 = vpop.f32.mrf.mxu1 }
 0x3b7   :  { %v683_v60 = vpop.f32.mrf.mxu1 }
 0x3b8   :  { %2418 = vmatmul.mubr.msk.f32.vlgmr.msra.gmra.mxu0 %vm95_vm0, %v683_v60 }
 0x3b9   :  { %v2408_v61 = vpop.f32.mrf.mxu1  ;;  %2432 = vmatpush3.msra.mxu0 %v935_v38  ;;  %v2194_v38 = vld [vmem:[%s3122_s16] ss:$0 sm:$0xff] }
 0x3ba   :  { %2433 = vmatprep.subr.mxu0 %v934_v39  ;;  %v2190_v61 = vld [vmem:[%s3120_s14] ss:$0 sm:$0xff] }
 0x3bb   :  { %2434 = vmatpush3.msra.mxu0 %v934_v39 }
 0x3bc   :  { %2435 = vmatprep.subr.mxu0 %v933_v40 }
 0x3bd   :  { %2436 = vmatpush3.msra.mxu0 %v933_v40 }
 0x3be   :  { %2437 = vmatprep.subr.mxu0 %v932_v41 }
 0x3bf   :  { %2438 = vmatpush3.msra.mxu0 %v932_v41 }
 0x3c0   :  { %2439 = vmatprep.subr.mxu0 %v931_v42 }
 0x3c1   :  { %2440 = vmatpush3.msra.mxu0 %v931_v42  ;;  %v2205_v42 = vld [vmem:[%s3135_s30 + $0x30] sm:$0xff] }
 0x3c2   :  { %2441 = vmatprep.subr.mxu0 %v930_v43 }
 0x3c3   :  { %2442 = vmatpush3.msra.mxu0 %v930_v43  ;;  %v2204_v43 = vld [vmem:[%s3135_s30 + $0x28] sm:$0xff] }
 0x3c4   :  { %2443 = vmatprep.subr.mxu0 %v929_v44 }
 0x3c5   :  { %2444 = vmatpush3.msra.mxu0 %v929_v44  ;;  %v2203_v44 = vld [vmem:[%s3135_s30 + $0x20] sm:$0xff] }
 0x3c6   :  { %2445 = vmatprep.subr.mxu0 %v928_v45 }
 0x3c7   :  { %2446 = vmatpush3.msra.mxu0 %v928_v45 }
 0x3c8   :  { %2472 = vmatprep.subr.mxu0 %v2214_v19 }
 0x478   :  { %v2419_v63 = vpop.f32.mrf.mxu0 }
 0x479   :  { %v776_v0 = vadd.f32 %v2419_v63, %v2182_v62 }
 0x47a   :  { %v770_v1 = vpop.f32.mrf.mxu0 }
 0x47b   :  { %v771_v2 = vadd.f32 %v2182_v62, %v770_v1  ;;  %v780_v3 = vadd.f32 %v776_v0, %v2813_v9 }
 0x47d   :  { %v786_v4 = vsel %vm95_vm0, %v780_v3, 0.0  ;;  %v779_v5 = vadd.f32 %v771_v2, %v2808_v8  ;;  %v828_v8 = vld [vmem:[#allocation6 + $0x10] sm:$0xff] }
 0x47e   :  { %787 = vadd.xlane.f32.xlu1 %v786_v4  ;;  %2422 = vmatprep.subr.mxu1 %v828_v8 }
 0x47f   :  { %v783_v6 = vsel %vm95_vm0, %v779_v5, 0.0  ;;  %2423 = vmatpush3.msra.mxu1 %v828_v8  ;;  %v2197_v8 = vld [vmem:[%s3134_s28 + $0x30] sm:$0xff] }
 0x480   :  { %784 = vadd.xlane.f32.xlu0 %v783_v6  ;;  %2424 = vmatprep.subr.mxu1 %v827_v20 }
 0x481   :  { %2425 = vmatpush3.msra.mxu1 %v827_v20  ;;  %v2213_v20 = vld [vmem:[%s3111_s5 + $0x30] sm:$0xff] }
 0x482   :  { %2426 = vmatprep.subr.mxu1 %v826_v21 }
 0x483   :  { %2427 = vmatpush3.msra.mxu1 %v826_v21  ;;  %v2196_v21 = vld [vmem:[%s3134_s28 + $0x28] sm:$0xff] }
 0x507   :  { %v788_v7 = vpop.xlane.xlu1 %787 }
 0x508   :  { %v791_v11 = vmul.f32 0.03125, %v788_v7 }
 0x509   :  { %v785_v12 = vpop.xlane.xlu0 %784 }
 0x50a   :  { %v793_v13 = vsub.f32 %v780_v3, %v791_v11  ;;  %v790_v14 = vmul.f32 0.03125, %v785_v12 }
 0x50c   :  { %v792_v15 = vsub.f32 %v779_v5, %v790_v14  ;;  %v795_v16 = vmul.f32 %v793_v13, %v793_v13 }
 0x50e   :  { %v799_v17 = vsel %vm95_vm0, %v795_v16, 0.0  ;;  %v794_v18 = vmul.f32 %v792_v15, %v792_v15 }
 0x50f   :  { %800 = vadd.xlane.f32.xlu1 %v799_v17 }
 0x510   :  { %v796_v9 = vsel %vm95_vm0, %v794_v18, 0.0 }
 0x511   :  { %797 = vadd.xlane.f32.xlu0 %v796_v9  ;;  %v2198_v9 = vld [vmem:[%s3134_s28 + $0x38] sm:$0xff] }
 0x512   :  { %2450 = vmatprep.subr.mxu1 %v2198_v9 }
 0x598   :  { %v801_v22 = vpop.xlane.xlu1 %800 }
 0x599   :  { %v803_v23 = vmul.f32 0.03125, %v801_v22  ;;  %v2212_v22 = vld [vmem:[%s3111_s5 + $0x28] sm:$0xff] }
 0x59a   :  { %v798_v24 = vpop.xlane.xlu0 %797 }
 0x59b   :  { %v805_v25 = vadd.f32 1e-05, %v803_v23  ;;  %v802_v26 = vmul.f32 0.03125, %v798_v24  ;;  %v2195_v23 = vld [vmem:[%s3134_s28 + $0x20] sm:$0xff] }
 0x59c   :  { %v2211_v24 = vld [vmem:[%s3111_s5 + $0x20] sm:$0xff] }
 0x59d   :  { %2570 = vrsqrt.f32 %v805_v25  ;;  %v804_v27 = vadd.f32 1e-05, %v802_v26  ;;  %v2206_v25 = vld [vmem:[%s3135_s30 + $0x38] sm:$0xff] }
 0x59f   :  { %2572 = vrsqrt.f32 %v804_v27 }
 0x5aa   :  { %v2571_v28 = vpop.eup %2570 }
 0x5ab   :  { %v809_v30 = vmul.f32 %v2571_v28, %v793_v13 }
 0x5ac   :  { %v2573_v31 = vpop.eup %2572 }
 0x5ad   :  { %v808_v32 = vmul.f32 %v2573_v31, %v792_v15  ;;  %v817_v33 = vmul.f32 %v2185_v29, %v809_v30 }
 0x5af   :  { %v816_v35 = vmul.f32 %v2185_v29, %v808_v32  ;;  %v825_v37 = vadd.f32 %v2186_v34, %v817_v33  ;;  %v2193_v33 = vld [vmem:[%s3121_s15] ss:$0 sm:$0xff] }
 0x5b1   :  { %v824_v36 = vadd.f32 %v2186_v34, %v816_v35 }
 0x5b3   :  { %2428 = vmatprep.mubr.msk.f32.mxu1 %vm95_vm0, %v824_v36 }
 0x5b4   :  { %2429 = vmatmul.mubr.msk.f32.vlgmr.msra.gmra.mxu1 %vm95_vm0, %v825_v37 }
 0x5b5   :  { %2451 = vmatpush3.msra.mxu1 %v2198_v9 }
 0x5b6   :  { %2452 = vmatprep.subr.mxu1 %v2197_v8 }
 0x5b7   :  { %2453 = vmatpush3.msra.mxu1 %v2197_v8 }
 0x5b8   :  { %2454 = vmatprep.subr.mxu1 %v2196_v21 }
 0x5b9   :  { %2455 = vmatpush3.msra.mxu1 %v2196_v21 }
 0x5ba   :  { %2456 = vmatprep.subr.mxu1 %v2195_v23 }
 0x5bb   :  { %2457 = vmatpush3.msra.mxu1 %v2195_v23  ;;  %v1665_v23 = vld [vmem:[#allocation3 + $0x28] sm:$0xff] }
 0x5bc   :  { %2461 = vmatprep.subr.mxu1 %v2206_v25 }
 0x674   :  { %v2430_v47 = vpop.f32.mrf.mxu1 }
 0x675   :  { %v915_v48 = vadd.f32 %v2430_v47, %v2187_v46  ;;  %v2216_v47 = vld [vmem:[%s3112_s6 + $0x1] ss:$0 sm:$0xff] }
 0x676   :  { %v909_v49 = vpop.f32.mrf.mxu1 }
 0x677   :  { %v921_v50 = vmul.f32 0.70710677, %v915_v48  ;;  %v910_v51 = vadd.f32 %v2187_v46, %v909_v49  ;;  %v919_v58 = vmul.f32 0.5, %v915_v48 }
 0x679   :  { %2574 = verf.f32 %v921_v50  ;;  %v920_v52 = vmul.f32 0.70710677, %v910_v51  ;;  %v918_v56 = vmul.f32 0.5, %v910_v51 }
 0x67b   :  { %2576 = verf.f32 %v920_v52  ;;  %v2200_v52 = vld [vmem:[%s3137_s21 + $0x1] ss:$0 sm:$0xff] }
 0x686   :  { %v2575_v53 = vpop.eup %2574 }
 0x687   :  { %v925_v55 = vadd.f32 1.0, %v2575_v53 }
 0x688   :  { %v2577_v54 = vpop.eup %2576 }
 0x689   :  { %v924_v57 = vadd.f32 1.0, %v2577_v54  ;;  %v927_v60 = vmul.f32 %v925_v55, %v919_v58  ;;  %v2208_v54 = vld [vmem:[%s3110_s4 + $0x1] ss:$0 sm:$0xff] }
 0x68b   :  { %v926_v59 = vmul.f32 %v924_v57, %v918_v56 }
 0x68d   :  { %2447 = vmatprep.mubr.msk.f32.mxu0 %vm943_vm3, %v926_v59 }
 0x68e   :  { %2448 = vmatmul.mubr.msk.f32.vlgmr.msra.gmra.mxu0 %vm943_vm3, %v927_v60 }
 0x68f   :  { %2473 = vmatpush3.msra.mxu0 %v2214_v19 }
 0x690   :  { %2474 = vmatprep.subr.mxu0 %v2213_v20 }
 0x691   :  { %2475 = vmatpush3.msra.mxu0 %v2213_v20  ;;  %v1666_v20 = vld [vmem:[#allocation3 + $0x30] sm:$0xff] }
 0x692   :  { %2476 = vmatprep.subr.mxu0 %v2212_v22 }
 0x693   :  { %2477 = vmatpush3.msra.mxu0 %v2212_v22 }
 0x694   :  { %2478 = vmatprep.subr.mxu0 %v2211_v24 }
 0x695   :  { %2479 = vmatpush3.msra.mxu0 %v2211_v24  ;;  %v1664_v24 = vld [vmem:[#allocation3 + $0x20] sm:$0xff] }
 0x696   :  { %2493 = vmatprep.subr.mxu0 %v2672_v10 }
 0x74e   :  { %v2449_v62 = vpop.f32.mrf.mxu0 }
 0x74f   :  { %v1022_v63 = vadd.f32 %v2449_v62, %v2190_v61 }
 0x750   :  { %v1016_v0 = vpop.f32.mrf.mxu0 }
 0x751   :  { %v1017_v1 = vadd.f32 %v2190_v61, %v1016_v0  ;;  %v1026_v2 = vadd.f32 %v1022_v63, %v825_v37 }
 0x753   :  { %v1032_v3 = vsel %vm95_vm0, %v1026_v2, 0.0  ;;  %v1025_v4 = vadd.f32 %v1017_v1, %v824_v36 }
 0x754   :  { %1033 = vadd.xlane.f32.xlu1 %v1032_v3 }
 0x755   :  { %v1029_v5 = vsel %vm95_vm0, %v1025_v4, 0.0 }
 0x756   :  { %1030 = vadd.xlane.f32.xlu0 %v1029_v5 }
 0x7dd   :  { %v1034_v6 = vpop.xlane.xlu1 %1033 }
 0x7de   :  { %v1036_v7 = vmul.f32 0.03125, %v1034_v6 }
 0x7df   :  { %v1031_v11 = vpop.xlane.xlu0 %1030 }
 0x7e0   :  { %v1038_v12 = vsub.f32 %v1026_v2, %v1036_v7  ;;  %v1035_v13 = vmul.f32 0.03125, %v1031_v11 }
 0x7e2   :  { %v1037_v14 = vsub.f32 %v1025_v4, %v1035_v13  ;;  %v1040_v15 = vmul.f32 %v1038_v12, %v1038_v12 }
 0x7e4   :  { %v1044_v16 = vsel %vm95_vm0, %v1040_v15, 0.0  ;;  %v1039_v17 = vmul.f32 %v1037_v14, %v1037_v14 }
 0x7e5   :  { %1045 = vadd.xlane.f32.xlu1 %v1044_v16 }
 0x7e6   :  { %v1041_v18 = vsel %vm95_vm0, %v1039_v17, 0.0  ;;  %v1667_v17 = vld [vmem:[#allocation3 + $0x38] sm:$0xff] }
 0x7e7   :  { %1042 = vadd.xlane.f32.xlu0 %v1041_v18 }
 0x86e   :  { %v1046_v26 = vpop.xlane.xlu1 %1045 }
 0x86f   :  { %v1048_v27 = vmul.f32 0.03125, %v1046_v26 }
 0x870   :  { %v1043_v28 = vpop.xlane.xlu0 %1042 }
 0x871   :  { %v1050_v29 = vadd.f32 1e-05, %v1048_v27  ;;  %v1047_v30 = vmul.f32 0.03125, %v1043_v28 }
 0x873   :  { %2578 = vrsqrt.f32 %v1050_v29  ;;  %v1049_v31 = vadd.f32 1e-05, %v1047_v30  ;;  %v2226_v29 = vld [vmem:[%s3114_s8 + $0x1] ss:$0 sm:$0xff] }
 0x875   :  { %2580 = vrsqrt.f32 %v1049_v31 }
 0x880   :  { %v2579_v32 = vpop.eup %2578 }
 0x881   :  { %v1054_v34 = vmul.f32 %v2579_v32, %v1038_v12 }
 0x882   :  { %v2581_v35 = vpop.eup %2580 }
 0x883   :  { %v1053_v36 = vmul.f32 %v2581_v35, %v1037_v14  ;;  %v1062_v37 = vmul.f32 %v2193_v33, %v1054_v34 }
 0x885   :  { %v1061_v39 = vmul.f32 %v2193_v33, %v1053_v36  ;;  %v2963_v41 = vadd.f32 %v2194_v38, %v1062_v37 }
 0x887   :  { %v2961_v40 = vadd.f32 %v2194_v38, %v1061_v39 }
 0x889   :  { %2458 = vmatprep.mubr.msk.f32.mxu1 %vm95_vm0, %v2961_v40  ;;  %2480 = vmatprep.mubr.msk.f32.mxu0 %vm95_vm0, %v2961_v40 }
 0x88a   :  { %2459 = vmatmul.mubr.msk.f32.vlgmr.msra.gmra.mxu1 %vm95_vm0, %v2963_v41  ;;  %2481 = vmatmul.mubr.msk.f32.vlgmr.msra.gmra.mxu0 %vm95_vm0, %v2963_v41 }
 0x88b   :  { %2462 = vmatpush3.msra.mxu1 %v2206_v25  ;;  %2469 = vmatprep.mubr.msk.f32.mxu1 %vm95_vm0, %v2961_v40 }
 0x88c   :  { %2463 = vmatprep.subr.mxu1 %v2205_v42  ;;  %2495 = vmatprep.mubr.msk.f32.mxu0 %vm2673_vm1, %v2672_v10 }
 0x88d   :  { %2464 = vmatpush3.msra.mxu1 %v2205_v42 }
 0x88e   :  { %2465 = vmatprep.subr.mxu1 %v2204_v43 }
 0x88f   :  { %2466 = vmatpush3.msra.mxu1 %v2204_v43 }
 0x890   :  { %2467 = vmatprep.subr.mxu1 %v2203_v44 }
 0x891   :  { %2468 = vmatpush3.msra.mxu1 %v2203_v44 }
 0x892   :  { %2470 = vmatmul.mubr.msk.f32.vlgmr.msra.gmra.mxu1 %vm95_vm0, %v2963_v41  ;;  %2483 = vmatprep.subr.mxu1 %v2672_v10 }
 0x893   :  { %2485 = vmatprep.mubr.msk.f32.mxu1 %vm2673_vm1, %v2672_v10 }
 0x94a   :  { %v2482_v45 = vpop.f32.mrf.mxu0  ;;  %v2460_v46 = vpop.f32.mrf.mxu1 }
 0x94b   :  { %v1162_v57 = vadd.f32 %v2460_v46, %v2200_v52  ;;  %v1338_v61 = vadd.f32 %v2482_v45, %v2216_v47 }
 0x94c   :  { %v1332_v48 = vpop.f32.mrf.mxu0  ;;  %v1156_v50 = vpop.f32.mrf.mxu1 }
 0x94d   :  { %v1333_v49 = vadd.f32 %v2216_v47, %v1332_v48  ;;  %v1157_v53 = vadd.f32 %v2200_v52, %v1156_v50  ;;  %v1342_v60 = vmul.f32 0.17677669, %v1162_v57  ;;  %v1807_v50 = vld [vmem:[#allocation6 + $0x28] sm:$0xff] }
 0x94f   :  { %2494 = vmatpush3.msra.mxu0 %v1333_v49  ;;  %v1341_v58 = vmul.f32 0.17677669, %v1157_v53  ;;  %v1809_v49 = vld [vmem:[#allocation6 + $0x38] sm:$0xff] }
 0x950   :  { %2503 = vmatprep.subr.mxu0 %v1667_v17 }
 0x952   :  { %v2471_v51 = vpop.f32.mrf.mxu1 }
 0x953   :  { %v1250_v59 = vadd.f32 %v2471_v51, %v2208_v54  ;;  %v1806_v51 = vld [vmem:[#allocation6 + $0x20] sm:$0xff] }
 0x954   :  { %v1244_v55 = vpop.f32.mrf.mxu1 }
 0x955   :  { %v1245_v56 = vadd.f32 %v2208_v54, %v1244_v55 }
 0x957   :  { %2484 = vmatpush3.xpose.msk.msra.mxu1 %vm95_vm0, %v1245_v56 }
 0x958   :  { %2488 = vmatprep.subr.mxu1 %v2672_v10 }
 0x95a   :  { %2486 = vmatmul.mubr.msk.f32.vlgmr.msra.gmra.mxu1 %vm95_vm0, %v1341_v58 }
 0x95b   :  { %2489 = vmatpush3.xpose.msk.msra.mxu1 %vm95_vm0, %v1250_v59  ;;  %2490 = vmatprep.mubr.msk.f32.mxu1 %vm2673_vm1, %v2672_v10  ;;  %v2231_v59 = vld [vmem:[%s3115_s9 + $0x1] ss:$0 sm:$0xff] }
 0x95c   :  { %2498 = vmatprep.subr.mxu1 %v2672_v10 }
 0x95e   :  { %2491 = vmatmul.mubr.msk.f32.vlgmr.msra.gmra.mxu1 %vm95_vm0, %v1342_v60 }
 0x95f   :  { %2499 = vmatpush3.msra.mxu1 %v1338_v61  ;;  %2500 = vmatprep.mubr.msk.f32.mxu1 %vm2673_vm1, %v2672_v10 }
 0x960   :  { %2514 = vmatprep.subr.mxu1 %v1809_v49 }
 0xa1a   :  { %v1415_v62 = vpop.f32.mrf.mxu1 }
 0xa1b   :  { %v1495_v63 = vsel %vm518_vm2, %v1415_v62, -inf }
 0xa1c   :  { %1496 = vmax.xlane.f32.xlu0 %v1495_v63  ;;  %v2487_v0 = vpop.f32.mrf.mxu1 }
 0xa1d   :  { %v2232_v0 = vld [vmem:[%s3116_s10 + $0x1] ss:$0 sm:$0xff] }
 0xa1e   :  { %v1491_v1 = vpop.f32.mrf.mxu1 }
 0xa1f   :  { %v1498_v2 = vsel %vm518_vm2, %v1491_v1, -inf }
 0xa20   :  { %1499 = vmax.xlane.f32.xlu1 %v1498_v2  ;;  %v2492_v3 = vpop.f32.mrf.mxu1 }
 0xaa5   :  { %v1497_v4 = vpop.xlane.xlu0 %1496 }
 0xaa6   :  { %v1501_v5 = vsub.f32 %v1415_v62, %v1497_v4  ;;  %v2244_v4 = vld [vmem:[%s3119_s13 + $0x78] sm:$0xff] }
 0xaa8   :  { %v1503_v6 = vmul.f32 1.442695, %v1501_v5  ;;  %v2243_v5 = vld [vmem:[%s3119_s13 + $0x70] sm:$0xff] }
 0xaa9   :  { %v1500_v7 = vpop.xlane.xlu1 %1499 }
 0xaaa   :  { %2582 = vpow2.f32 %v1503_v6  ;;  %v1502_v11 = vsub.f32 %v1491_v1, %v1500_v7  ;;  %v2242_v6 = vld [vmem:[%s3119_s13 + $0x68] sm:$0xff]  ;;  %v2241_v7 = vld [vmem:[%s3119_s13 + $0x60] sm:$0xff] }
 0xaac   :  { %v1505_v12 = vmul.f32 1.442695, %v1502_v11  ;;  %v2240_v11 = vld [vmem:[%s3119_s13 + $0x58] sm:$0xff] }
 0xaae   :  { %2584 = vpow2.f32 %v1505_v12  ;;  %v2239_v12 = vld [vmem:[%s3119_s13 + $0x50] sm:$0xff] }
 0xab7   :  { %v2583_v13 = vpop.eup %2582 }
 0xab8   :  { %v1507_v14 = vsel %vm518_vm2, %v2583_v13, 0.0 }
 0xab9   :  { %1508 = vadd.xlane.f32.xlu0 %v1507_v14  ;;  %v2237_v14 = vld [vmem:[%s3119_s13 + $0x40] sm:$0xff] }
 0xabb   :  { %v2585_v15 = vpop.eup %2584 }
 0xabc   :  { %v1510_v16 = vsel %vm518_vm2, %v2585_v15, 0.0 }
 0xabd   :  { %1511 = vadd.xlane.f32.xlu1 %v1510_v16 }
 0xb42   :  { %v1509_v18 = vpop.xlane.xlu0 %1508 }
 0xb43   :  { %2586 = vrcp.f32 %v1509_v18 }
 0xb46   :  { %v1512_v9 = vpop.xlane.xlu1 %1511 }
 0xb47   :  { %2588 = vrcp.f32 %v1512_v9 }
 0xb50   :  { %v2587_v19 = vpop.eup %2586 }
 0xb51   :  { %v1515_v8 = vmul.f32 %v2587_v19, %v2583_v13  ;;  %v2238_v13 = vld [vmem:[%s3119_s13 + $0x48] sm:$0xff] }
 0xb53   :  { %2496 = vmatmul.mubr.msk.f32.vlgmr.msra.gmra.mxu0 %vm518_vm2, %v1515_v8 }
 0xb54   :  { %v2589_v21 = vpop.eup %2588  ;;  %2504 = vmatpush3.msra.mxu0 %v1667_v17 }
 0xb55   :  { %v1516_v22 = vmul.f32 %v2589_v21, %v2585_v15  ;;  %2505 = vmatprep.subr.mxu0 %v1666_v20  ;;  %v2234_v15 = vld [vmem:[%s3118_s12 + $0x1] ss:$0 sm:$0xff] }
 0xb56   :  { %2506 = vmatpush3.msra.mxu0 %v1666_v20 }
 0xb57   :  { %2501 = vmatmul.mubr.msk.f32.vlgmr.msra.gmra.mxu1 %vm518_vm2, %v1516_v22  ;;  %2507 = vmatprep.subr.mxu0 %v1665_v23 }
 0xb58   :  { %2508 = vmatpush3.msra.mxu0 %v1665_v23  ;;  %2515 = vmatpush3.msra.mxu1 %v1809_v49  ;;  %v2068_v49 = vld [vmem:[%s3123_s17 + $0x10] sm:$0xff] }
 0xb59   :  { %2509 = vmatprep.subr.mxu0 %v1664_v24 }
 0xb5a   :  { %2510 = vmatpush3.msra.mxu0 %v1664_v24 }
 0xb5b   :  { %2525 = vmatprep.subr.mxu0 %v2244_v4 }
 0xc13   :  { %v1586_v25 = vpop.f32.mrf.mxu0 }
 0xc14   :  { %2511 = vmatprep.mubr.msk.f32.mxu0 %vm95_vm0, %v1586_v25 }
 0xc15   :  { %v2497_v26 = vpop.f32.mrf.mxu0 }
 0xc17   :  { %v1659_v27 = vpop.f32.mrf.mxu1 }
 0xc18   :  { %2512 = vmatmul.mubr.msk.f32.vlgmr.msra.gmra.mxu0 %vm95_vm0, %v1659_v27 }
 0xc19   :  { %v2502_v28 = vpop.f32.mrf.mxu1  ;;  %2526 = vmatpush3.msra.mxu0 %v2244_v4 }
 0xc1a   :  { %2527 = vmatprep.subr.mxu0 %v2243_v5  ;;  %v2246_v28 = vld [vmem:[%s3120_s14 + $0x1] ss:$0 sm:$0xff] }
 0xc1b   :  { %2528 = vmatpush3.msra.mxu0 %v2243_v5 }
 0xc1c   :  { %2529 = vmatprep.subr.mxu0 %v2242_v6 }
 0xc1d   :  { %2530 = vmatpush3.msra.mxu0 %v2242_v6 }
 0xc1e   :  { %2531 = vmatprep.subr.mxu0 %v2241_v7 }
 0xc1f   :  { %2532 = vmatpush3.msra.mxu0 %v2241_v7 }
 0xc20   :  { %2533 = vmatprep.subr.mxu0 %v2240_v11 }
 0xc21   :  { %2534 = vmatpush3.msra.mxu0 %v2240_v11 }
 0xc22   :  { %2535 = vmatprep.subr.mxu0 %v2239_v12 }
 0xc23   :  { %2536 = vmatpush3.msra.mxu0 %v2239_v12  ;;  %v2253_v12 = vld [vmem:[%s3124_s18] ss:$0 sm:$0xff] }
 0xc24   :  { %2537 = vmatprep.subr.mxu0 %v2238_v13 }
 0xc25   :  { %2538 = vmatpush3.msra.mxu0 %v2238_v13 }
 0xc26   :  { %2539 = vmatprep.subr.mxu0 %v2237_v14 }
 0xc27   :  { %2540 = vmatpush3.msra.mxu0 %v2237_v14 }
 0xcd8   :  { %v2513_v30 = vpop.f32.mrf.mxu0 }
 0xcd9   :  { %v1754_v31 = vadd.f32 %v2513_v30, %v2226_v29 }
 0xcda   :  { %v1748_v32 = vpop.f32.mrf.mxu0 }
 0xcdb   :  { %v1749_v33 = vadd.f32 %v2226_v29, %v1748_v32  ;;  %v1758_v34 = vadd.f32 %v1754_v31, %v2963_v41 }
 0xcdd   :  { %v1766_v35 = vsel %vm95_vm0, %v1758_v34, 0.0  ;;  %v1757_v36 = vadd.f32 %v1749_v33, %v2961_v40  ;;  %v1808_v40 = vld [vmem:[#allocation6 + $0x30] sm:$0xff] }
 0xcde   :  { %1767 = vadd.xlane.f32.xlu1 %v1766_v35  ;;  %2516 = vmatprep.subr.mxu1 %v1808_v40 }
 0xcdf   :  { %v1763_v37 = vsel %vm95_vm0, %v1757_v36, 0.0  ;;  %2517 = vmatpush3.msra.mxu1 %v1808_v40  ;;  %v2067_v40 = vld [vmem:[%s3123_s17 + $0x8] sm:$0xff] }
 0xce0   :  { %1764 = vadd.xlane.f32.xlu0 %v1763_v37  ;;  %2518 = vmatprep.subr.mxu1 %v1807_v50 }
 0xce1   :  { %2519 = vmatpush3.msra.mxu1 %v1807_v50  ;;  %v2066_v50 = vld [vmem:[%s3123_s17] sm:$0xff] }
 0xce2   :  { %2520 = vmatprep.subr.mxu1 %v1806_v51 }
 0xce3   :  { %2521 = vmatpush3.msra.mxu1 %v1806_v51 }
 0xce4   :  { %2544 = vmatprep.subr.mxu1 %v2672_v10 }
 0xd67   :  { %v1768_v38 = vpop.xlane.xlu1 %1767 }
 0xd68   :  { %v1770_v39 = vmul.f32 0.03125, %v1768_v38 }
 0xd69   :  { %v1765_v42 = vpop.xlane.xlu0 %1764 }
 0xd6a   :  { %v1772_v43 = vsub.f32 %v1758_v34, %v1770_v39  ;;  %v1769_v44 = vmul.f32 0.03125, %v1765_v42 }
 0xd6c   :  { %v1771_v45 = vsub.f32 %v1757_v36, %v1769_v44  ;;  %v1774_v46 = vmul.f32 %v1772_v43, %v1772_v43 }
 0xd6e   :  { %v1778_v47 = vsel %vm95_vm0, %v1774_v46, 0.0  ;;  %v1773_v48 = vmul.f32 %v1771_v45, %v1771_v45 }
 0xd6f   :  { %1779 = vadd.xlane.f32.xlu1 %v1778_v47 }
 0xd70   :  { %v1775_v41 = vsel %vm95_vm0, %v1773_v48, 0.0 }
 0xd71   :  { %1776 = vadd.xlane.f32.xlu0 %v1775_v41  ;;  %v2069_v41 = vld [vmem:[%s3123_s17 + $0x18] sm:$0xff] }
 0xdf8   :  { %v1780_v52 = vpop.xlane.xlu1 %1779 }
 0xdf9   :  { %v1782_v53 = vmul.f32 0.03125, %v1780_v52 }
 0xdfa   :  { %v1777_v54 = vpop.xlane.xlu0 %1776 }
 0xdfb   :  { %v1784_v55 = vadd.f32 1e-05, %v1782_v53  ;;  %v1781_v56 = vmul.f32 0.03125, %v1777_v54 }
 0xdfd   :  { %2590 = vrsqrt.f32 %v1784_v55  ;;  %v1783_v57 = vadd.f32 1e-05, %v1781_v56 }
 0xdff   :  { %2592 = vrsqrt.f32 %v1783_v57 }
 0xe0a   :  { %v2591_v58 = vpop.eup %2590 }
 0xe0b   :  { %v1788_v60 = vmul.f32 %v2591_v58, %v1772_v43  ;;  %v2251_v58 = vld [vmem:[%s3121_s15 + $0x1] ss:$0 sm:$0xff] }
 0xe0c   :  { %v2593_v61 = vpop.eup %2592 }
 0xe0d   :  { %v1787_v62 = vmul.f32 %v2593_v61, %v1771_v45  ;;  %v1796_v63 = vmul.f32 %v2231_v59, %v1788_v60 }
 0xe0f   :  { %v1795_v1 = vmul.f32 %v2231_v59, %v1787_v62  ;;  %v1804_v3 = vadd.f32 %v2232_v0, %v1796_v63 }
 0xe11   :  { %v1803_v2 = vadd.f32 %v2232_v0, %v1795_v1 }
 0xe13   :  { %2522 = vmatprep.mubr.msk.f32.mxu1 %vm95_vm0, %v1803_v2 }
 0xe14   :  { %2523 = vmatmul.mubr.msk.f32.vlgmr.msra.gmra.mxu1 %vm95_vm0, %v1804_v3 }
 0xe15   :  { %2552 = vmatprep.mubr.msk.f32.mxu1 %vm2673_vm1, %v2672_v10  ;;  %2545 = vmatpush3.msra.mxu1 %v2069_v41 }
 0xe16   :  { %2546 = vmatprep.subr.mxu1 %v2672_v10 }
 0xe17   :  { %2547 = vmatpush3.msra.mxu1 %v2068_v49 }
 0xe18   :  { %2548 = vmatprep.subr.mxu1 %v2672_v10 }
 0xe19   :  { %2549 = vmatpush3.msra.mxu1 %v2067_v40 }
 0xe1a   :  { %2550 = vmatprep.subr.mxu1 %v2672_v10  ;;  %v2252_v10 = vld [vmem:[%s3122_s16 + $0x1] ss:$0 sm:$0xff] }
 0xe1b   :  { %2551 = vmatpush3.msra.mxu1 %v2066_v50 }
 0xed4   :  { %v2524_v16 = vpop.f32.mrf.mxu1 }
 0xed5   :  { %v1896_v17 = vadd.f32 %v2524_v16, %v2234_v15 }
 0xed6   :  { %v1890_v18 = vpop.f32.mrf.mxu1 }
 0xed7   :  { %v1902_v9 = vmul.f32 0.70710677, %v1896_v17  ;;  %v1891_v19 = vadd.f32 %v2234_v15, %v1890_v18  ;;  %v1900_v25 = vmul.f32 0.5, %v1896_v17 }
 0xed9   :  { %2594 = verf.f32 %v1902_v9  ;;  %v1901_v8 = vmul.f32 0.70710677, %v1891_v19  ;;  %v1899_v23 = vmul.f32 0.5, %v1891_v19 }
 0xedb   :  { %2596 = verf.f32 %v1901_v8 }
 0xee6   :  { %v2595_v20 = vpop.eup %2594 }
 0xee7   :  { %v1906_v22 = vadd.f32 1.0, %v2595_v20 }
 0xee8   :  { %v2597_v21 = vpop.eup %2596 }
 0xee9   :  { %v1905_v24 = vadd.f32 1.0, %v2597_v21  ;;  %v1908_v27 = vmul.f32 %v1906_v22, %v1900_v25 }
 0xeeb   :  { %v1907_v26 = vmul.f32 %v1905_v24, %v1899_v23 }
 0xeed   :  { %2541 = vmatprep.mubr.msk.f32.mxu0 %vm943_vm3, %v1907_v26 }
 0xeee   :  { %2542 = vmatmul.mubr.msk.f32.vlgmr.msra.gmra.mxu0 %vm943_vm3, %v1908_v27 }
 0xfae   :  { %v2543_v29 = vpop.f32.mrf.mxu0 }
 0xfaf   :  { %v2004_v30 = vadd.f32 %v2543_v29, %v2246_v28 }
 0xfb0   :  { %v1998_v31 = vpop.f32.mrf.mxu0 }
 0xfb1   :  { %v1999_v32 = vadd.f32 %v2246_v28, %v1998_v31  ;;  %v2008_v33 = vadd.f32 %v2004_v30, %v1804_v3  ;;  %v2055_v3 = vld [vmem:[#allocation2] sm:$0xff] }
 0xfb3   :  { %v2016_v34 = vsel %vm95_vm0, %v2008_v33, 0.0  ;;  %v2007_v35 = vadd.f32 %v1999_v32, %v1803_v2 }
 0xfb4   :  { %2017 = vadd.xlane.f32.xlu1 %v2016_v34 }
 0xfb5   :  { %v2013_v36 = vsel %vm95_vm0, %v2007_v35, 0.0 }
 0xfb6   :  { %2014 = vadd.xlane.f32.xlu0 %v2013_v36 }
0x103d   :  { %v2018_v37 = vpop.xlane.xlu1 %2017 }
0x103e   :  { %v2020_v38 = vmul.f32 0.03125, %v2018_v37 }
0x103f   :  { %v2015_v39 = vpop.xlane.xlu0 %2014 }
0x1040   :  { %v2022_v42 = vsub.f32 %v2008_v33, %v2020_v38  ;;  %v2019_v43 = vmul.f32 0.03125, %v2015_v39 }
0x1042   :  { %v2021_v44 = vsub.f32 %v2007_v35, %v2019_v43  ;;  %v2024_v45 = vmul.f32 %v2022_v42, %v2022_v42 }
0x1044   :  { %v2028_v46 = vsel %vm95_vm0, %v2024_v45, 0.0  ;;  %v2023_v47 = vmul.f32 %v2021_v44, %v2021_v44 }
0x1045   :  { %2029 = vadd.xlane.f32.xlu1 %v2028_v46 }
0x1046   :  { %v2025_v48 = vsel %vm95_vm0, %v2023_v47, 0.0 }
0x1047   :  { %2026 = vadd.xlane.f32.xlu0 %v2025_v48 }
0x10ce   :  { %v2030_v51 = vpop.xlane.xlu1 %2029 }
0x10cf   :  { %v2032_v52 = vmul.f32 0.03125, %v2030_v51 }
0x10d0   :  { %v2027_v53 = vpop.xlane.xlu0 %2026 }
0x10d1   :  { %v2034_v54 = vadd.f32 1e-05, %v2032_v52  ;;  %v2031_v55 = vmul.f32 0.03125, %v2027_v53 }
0x10d3   :  { %2598 = vrsqrt.f32 %v2034_v54  ;;  %v2033_v56 = vadd.f32 1e-05, %v2031_v55 }
0x10d5   :  { %2600 = vrsqrt.f32 %v2033_v56 }
0x10e0   :  { %v2599_v57 = vpop.eup %2598 }
0x10e1   :  { %v2038_v59 = vmul.f32 %v2599_v57, %v2022_v42 }
0x10e2   :  { %v2601_v60 = vpop.eup %2600 }
0x10e3   :  { %v2046_v61 = vmul.f32 %v2251_v58, %v2038_v59  ;;  %v2037_v62 = vmul.f32 %v2601_v60, %v2021_v44 }
0x10e5   :  { %v2054_v63 = vadd.f32 %v2252_v10, %v2046_v61  ;;  %v2045_v0 = vmul.f32 %v2251_v58, %v2037_v62 }
0x10e7   :  { %v2053_v1 = vadd.f32 %v2252_v10, %v2045_v0  ;;  %v2057_v2 = vsel %vm95_vm0, %v2054_v63, 0.0 }
0x10e9   :  { %v2056_v4 = vsel %vm95_vm0, %v2053_v1, 0.0 }
0x10ea   :  { %v2058_v5 = vadd.f32 %v2057_v2, %v2056_v4 }
0x10ec   :  { %v2059_v6 = vadd.f32 %v2058_v5, %v2055_v3 }
0x10ee   :  { %2060 = vst.msk [vmem:[#allocation2] sm:$0xff] %vm95_vm0, %v2059_v6 }
0x10f5   :  { %v2064_v7 = vld [vmem:[#allocation2] sm:$0xff] }
0x10f6   :  { %v2065_v11 = vmul.f32 0.5, %v2064_v7 }
0x10f8   :  { %2553 = vmatmul.mubr.msk.f32.vlgmr.msra.gmra.mxu1 %vm95_vm0, %v2065_v11 }
0x11b8   :  { %v2146_v13 = vpop.f32.mrf.mxu1 }
0x11b9   :  { %v2147_v14 = vadd.f32 %v2253_v12, %v2146_v13 }
0x11ba   :  { %v2554_v15 = vpop.f32.mrf.mxu1 }
0x11bb   :  { %2150 = vst.msk [vmem:[#allocation8] sm:$0xff] %vm518_vm2, %v2147_v14 }
0x11bc   :  { %2653 = shalt.err (!%p2650_p0)
}
0x11bd   :  { %2160 = dma.vmem_to_hbm [thread:$0]  %s2158_s25, 128, %s3125_s19, [#allocation5]  }
0x11be   :  { %2666 = dma.done.wait [#allocation5], 128  }
0x11bf   :  { %2667 = vsyncadd [#allocation5], 4294967168 }
0x11c0   :  { %2164 = vsyncpa [#allocation4], 1 }
0x11c1   :  { %2165 = vsyncpa [#allocation7], 1 }
0x11c2   :  { %2166 = vsyncpa [#allocation5], 1 }

</bundles_post_ra>
